<compile_context>
chip_gen: v7x
topology: tpu7x:2x2x1
jax: 0.10.0
libtpu: 0.0.40
codegen_flags: <defaults>
</compile_context>

<pallas_src>
import functools

import jax
import jax.numpy as jnp
from jax import lax
from jax.experimental import pallas as pl
from jax.experimental.pallas import tpu as pltpu

EPS = 1e-5
NEG_INF = -1e30      # finite mask value: exp() underflows to 0, avoids (-inf) - (-inf) NaNs


# --------------------------------------------------------------------------------------
# fused kernel
# --------------------------------------------------------------------------------------
def _layernorm(v, g, beta):
    mu = jnp.mean(v, axis=-1, keepdims=True)
    d = v - mu
    var = jnp.mean(d * d, axis=-1, keepdims=True)
    return d * lax.rsqrt(var + EPS) * g + beta


def _fused_kernel(x_ref, wt_ref, btk_ref, p_ref, pt_ref, gtm_ref, btm_ref,
                  pos_ref, mask_ref,
                  wqkv_ref, wu_ref, bu_ref, ln1g_ref, ln1b_ref,
                  wff1_ref, bff1_ref, wff2_ref, bff2_ref, ln2g_ref, ln2b_ref,
                  wout_ref, bout_ref,
                  out_ref, *, b, t, e, heads, depth):
    f32 = jnp.float32
    bf16 = jnp.bfloat16
    bt = b * t
    n_inv = 1.0 / float(bt)
    gpr = e // t
    he = heads * e

    # ---- token embedding: Linear(4, e).  K=4 -> 4 VPU broadcast-FMAs (exact f32); an MXU
    #      pass would leave >96% of the weight registers empty.
    x = x_ref[...]                                           # (bt, 4)
    wt = wt_ref[...]                                         # (4, e)
    tok2 = btk_ref[...] + x[:, 0:1] * wt[0:1, :]
    for k in range(1, x.shape[1]):
        tok2 = tok2 + x[:, k:k + 1] * wt[k:k + 1, :]          # (bt, e) f32

    # ---- BatchNorm1d on the faithful `.view(b, e, t)` memory reinterpretation -----------
    # With t | e, BN channel c maps to (row ti = c // gpr, lane-group g = c % gpr of width
    # t).  Per-channel statistics are computed with the 0/1 grouping matrices P (e, gpr) /
    # PT (gpr, e) as single-pass bf16 MXU matmuls with f32 accumulation (review #5).
    Pb = p_ref[...].astype(bf16)
    PTb = pt_ref[...].astype(bf16)
    tok3 = tok2.reshape(b, t, e)
    gs = jnp.dot(tok2.astype(bf16), Pb, preferred_element_type=f32)       # (bt, gpr)
    mu_ch = jnp.sum(gs.reshape(b, t, gpr), axis=0) * n_inv                # (t, gpr)
    mu_map = jnp.dot(mu_ch.astype(bf16), PTb, preferred_element_type=f32)  # (t, e)
    d = tok3 - mu_map                                                     # (b, t, e)
    vs = jnp.dot((d * d).reshape(bt, e).astype(bf16), Pb,
                 preferred_element_type=f32)                              # (bt, gpr)
    var_ch = jnp.sum(vs.reshape(b, t, gpr), axis=0) * n_inv               # (t, gpr)
    var_map = jnp.dot(var_ch.astype(bf16), PTb, preferred_element_type=f32)
    tok_act = jnp.maximum(
        d * lax.rsqrt(var_map + EPS) * gtm_ref[...] + btm_ref[...], 0.0)  # (b, t, e)

    # positional branch is x-independent and precomputed once in prepare_params (review #4)
    h = tok_act + pos_ref[...]                                            # (b,t,e)+(t,e)

    # block-diagonal (head, batch) + causal mask over (heads*b*t) rows, precomputed constant
    allowed = mask_ref[...] > 0.5                             # (heads*bt, heads*bt) bool
    inv_scale = 1.0 / (float(e) ** 0.5)

    # ---- transformer blocks (statically unrolled) ---------------------------------------
    for layer in range(depth):
        h2 = h.reshape(bt, e)

        # fused QKV projection: one (bt, e) @ (e, 3*heads*e) bf16 MXU matmul, f32 acc.
        # column order: [Q_h0 .. Q_h{H-1} | K_h0 .. | V_h0 ..]  (review #3)
        qkv = jnp.dot(h2.astype(bf16), wqkv_ref[layer],
                      preferred_element_type=f32)             # (bt, 3*heads*e)

        def stack_heads(goff):
            # (bt, heads*e) lane-group -> (heads*bt, e) rows in (head, batch, time) order
            return jnp.concatenate(
                [qkv[:, goff + hh * e: goff + (hh + 1) * e] for hh in range(heads)],
                axis=0)

        q_all = stack_heads(0).astype(bf16)                   # (heads*bt, e)
        k_all = stack_heads(he).astype(bf16)
        v_all = stack_heads(2 * he).astype(bf16)

        # ONE block-diagonal attention per layer (review #2)
        dots = jnp.einsum("qe,ke->qk", q_all, k_all,
                          preferred_element_type=f32) * inv_scale
        dots = jnp.where(allowed, dots, NEG_INF)
        m = jnp.max(dots, axis=-1, keepdims=True)
        p = jnp.exp(dots - m)
        p = p / jnp.sum(p, axis=-1, keepdims=True)            # exact softmax division
        att = jnp.dot(p.astype(bf16), v_all,
                      preferred_element_type=f32)             # (heads*bt, e)

        # unify projection as a sum of per-head (bt,e)@(e,e) products (review #1)
        wu_l = wu_ref[layer]                                  # (heads, e, e) bf16
        uni = bu_ref[layer]                                   # (1, e)
        for hh in range(heads):
            uni = uni + jnp.dot(att[hh * bt:(hh + 1) * bt, :].astype(bf16), wu_l[hh],
                                preferred_element_type=f32)
        y = _layernorm(uni + h2, ln1g_ref[layer], ln1b_ref[layer])        # (bt, e)

        hid = jnp.maximum(jnp.dot(y.astype(bf16), wff1_ref[layer],
                                  preferred_element_type=f32) + bff1_ref[layer], 0.0)
        ff = jnp.dot(hid.astype(bf16), wff2_ref[layer],
                     preferred_element_type=f32) + bff2_ref[layer]
        h = _layernorm(ff + y, ln2g_ref[layer], ln2b_ref[layer]).reshape(b, t, e)

    # ---- output head: (bt, e) @ (e, v) + log_softmax ------------------------------------
    logits = jnp.dot(h.reshape(bt, e).astype(bf16), wout_ref[...],
                     preferred_element_type=f32) + bout_ref[...]
    m = jnp.max(logits, axis=-1, keepdims=True)
    s = logits - m
    out_ref[...] = s - jnp.log(jnp.sum(jnp.exp(s), axis=-1, keepdims=True))


# --------------------------------------------------------------------------------------
# one-time parameter packing (review #6): bf16 MXU operand casts, per-layer stacking, BN
# channel->(row, lane-group) maps, and the x-independent positional branch.
# --------------------------------------------------------------------------------------
def prepare_params(params, seq_length):
    f32 = jnp.float32
    bf16 = jnp.bfloat16
    t = seq_length
    e = params["w_tok"].shape[1]
    v = params["w_out"].shape[1]
    heads = params["blocks"][0]["wq"].shape[0]
    assert e % t == 0, "BN-on-view grouping used by the kernel assumes t divides e"
    gpr = e // t

    # 0/1 lane-group matrices for the token-BN statistics (exact in bf16).
    lane = jnp.arange(e)[:, None]
    grp = jnp.arange(gpr)[None, :]
    P = (lane // t == grp).astype(f32)          # (e, gpr)
    PT = P.T                                    # (gpr, e)

    def bn_map(p_vec):
        # per-channel param (e,) -> per-element (t, e) map under the .view(b, e, t) bug
        return jnp.repeat(p_vec.reshape(t, gpr), t, axis=1)

    # ---- positional branch (independent of x): Linear + BN-on-view + ReLU -> (t, e) -----
    trange = jnp.arange(t, dtype=f32).reshape(1, t)
    posvec = (jnp.dot(trange, params["w_pos"], precision=lax.Precision.HIGHEST,
                      preferred_element_type=f32) + params["b_pos"]).reshape(e)
    g_mean = posvec.reshape(gpr, t).mean(axis=1)            # (gpr,)
    pmu = jnp.repeat(g_mean, t)                             # (e,)
    g_var = ((posvec - pmu) ** 2).reshape(gpr, t).mean(axis=1)
    pvar = jnp.repeat(g_var, t)                             # (e,)
    pos_norm = (posvec - pmu) * lax.rsqrt(pvar + EPS)       # (e,)
    pos_act = jnp.maximum(pos_norm[None, :] * bn_map(params["bn_pos_g"])
                          + bn_map(params["bn_pos_b"]), 0.0)             # (t, e)

    blocks = params["blocks"]

    def qkv_layer(blk):
        wq = jnp.concatenate([blk["wq"][hh] for hh in range(heads)], axis=1)
        wk = jnp.concatenate([blk["wk"][hh] for hh in range(heads)], axis=1)
        wv = jnp.concatenate([blk["wv"][hh] for hh in range(heads)], axis=1)
        return jnp.concatenate([wq, wk, wv], axis=1)        # (e, 3*heads*e)

    return dict(
        w_tok=params["w_tok"].astype(f32),
        b_tok=params["b_tok"].reshape(1, e).astype(f32),
        P=P, PT=PT,
        gtm=bn_map(params["bn_tok_g"]), btm=bn_map(params["bn_tok_b"]),
        pos_act=pos_act,
        wqkv=jnp.stack([qkv_layer(blk) for blk in blocks]).astype(bf16),   # (depth,e,3he)
        wu=jnp.stack([blk["wu"] for blk in blocks]).astype(bf16),          # (depth,h,e,e)
        bu=jnp.stack([blk["bu"].reshape(1, e) for blk in blocks]),
        ln1g=jnp.stack([blk["ln1_g"].reshape(1, e) for blk in blocks]),
        ln1b=jnp.stack([blk["ln1_b"].reshape(1, e) for blk in blocks]),
        wff1=jnp.stack([blk["w_ff1"] for blk in blocks]).astype(bf16),     # (depth,e,4e)
        bff1=jnp.stack([blk["b_ff1"].reshape(1, -1) for blk in blocks]),
        wff2=jnp.stack([blk["w_ff2"] for blk in blocks]).astype(bf16),     # (depth,4e,e)
        bff2=jnp.stack([blk["b_ff2"].reshape(1, e) for blk in blocks]),
        ln2g=jnp.stack([blk["ln2_g"].reshape(1, e) for blk in blocks]),
        ln2b=jnp.stack([blk["ln2_b"].reshape(1, e) for blk in blocks]),
        w_out=params["w_out"].astype(bf16),
        b_out=params["b_out"].reshape(1, v),
    )


# --------------------------------------------------------------------------------------
# per-call wrapper: only reshapes x, builds the constant mask, launches the fused kernel
# --------------------------------------------------------------------------------------
def gtransformer_forward(x, packed):
    b, t, cin = x.shape
    depth, heads = packed["wu"].shape[0], packed["wu"].shape[1]
    e = packed["w_tok"].shape[1]
    v = packed["w_out"].shape[1]
    assert packed["pos_act"].shape[0] == t

    # block-diagonal (head, batch) + causal mask; pure shape constant -> folded by XLA.
    R = heads * b * t
    idx = jnp.arange(R)
    same_blk = (idx[:, None] // t) == (idx[None, :] // t)
    mask01 = (same_blk & (idx[None, :] <= idx[:, None])).astype(jnp.float32)

    args = (x.reshape(b * t, cin).astype(jnp.float32),
            packed["w_tok"], packed["b_tok"], packed["P"], packed["PT"],
            packed["gtm"], packed["btm"], packed["pos_act"], mask01,
            packed["wqkv"], packed["wu"], packed["bu"], packed["ln1g"], packed["ln1b"],
            packed["wff1"], packed["bff1"], packed["wff2"], packed["bff2"],
            packed["ln2g"], packed["ln2b"], packed["w_out"], packed["b_out"])

    vmem = pl.BlockSpec(memory_space=pltpu.MemorySpace.VMEM)
    kernel = functools.partial(_fused_kernel, b=b, t=t, e=e, heads=heads, depth=depth)
    out2d = pl.pallas_call(
        kernel,
        out_shape=jax.ShapeDtypeStruct((b * t, v), jnp.float32),
        in_specs=[vmem] * len(args),
        out_specs=vmem,
        # total residency is <1 MiB; 32 MiB keeps the fused design portable to v7x (64 MiB).
        compiler_params=pltpu.CompilerParams(vmem_limit_bytes=32 * 1024 * 1024),
    )(*args)
    return out2d.reshape(b, t, v)


# --------------------------------------------------------------------------------------
# pure-JAX reference (same math; bf16 MXU operands mirrored, BN statistics exact f32)
# --------------------------------------------------------------------------------------
def reference_forward(x, params, heads):
    f32 = jnp.float32
    bf16 = jnp.bfloat16
    hi = lax.Precision.HIGHEST
    b, t, _ = x.shape
    e = params["w_tok"].shape[1]
    v = params["w_out"].shape[1]

    def mm(a, w):
        return jnp.dot(a.astype(bf16), w.astype(bf16), preferred_element_type=f32)

    tokens = jnp.dot(x, params["w_tok"], precision=hi,
                     preferred_element_type=f32) + params["b_tok"]

    def bn_view(v_bte, g, beta):
        vv = v_bte.reshape(b, e, t)                       # faithful .view(b, e, t)
        mu = vv.mean(axis=(0, 2), keepdims=True)
        var = ((vv - mu) ** 2).mean(axis=(0, 2), keepdims=True)
        out = (vv - mu) * lax.rsqrt(var + EPS) * g.reshape(1, e, 1) + beta.reshape(1, e, 1)
        return out.reshape(b, t, e)

    tokens = jnp.maximum(bn_view(tokens, params["bn_tok_g"], params["bn_tok_b"]), 0.0)
    trange = jnp.arange(t, dtype=f32).reshape(1, t)
    posvec = jnp.dot(trange, params["w_pos"], precision=hi,
                     preferred_element_type=f32) + params["b_pos"]
    positions = jnp.broadcast_to(posvec[None, :, :], (b, t, e))
    positions = jnp.maximum(bn_view(positions, params["bn_pos_g"], params["bn_pos_b"]), 0.0)

    h = tokens + positions
    mask = jnp.tril(jnp.ones((t, t), dtype=bool))
    inv_scale = 1.0 / (float(e) ** 0.5)

    def ln(vv, g, beta):
        mu = vv.mean(axis=-1, keepdims=True)
        d = vv - mu
        var = (d * d).mean(axis=-1, keepdims=True)
        return d * lax.rsqrt(var + EPS) * g + beta

    for blk in params["blocks"]:
        h2 = h.reshape(b * t, e)
        outs = []
        for i in range(heads):
            qh = mm(h2, blk["wq"][i]).reshape(b, t, e)
            kh = mm(h2, blk["wk"][i]).reshape(b, t, e)
            vh = mm(h2, blk["wv"][i]).reshape(b, t, e)
            dots = jnp.einsum("bqe,bke->bqk", qh.astype(bf16), kh.astype(bf16),
                              preferred_element_type=f32) * inv_scale
            dots = jnp.where(mask, dots, NEG_INF)
            m = jnp.max(dots, axis=-1, keepdims=True)
            p = jnp.exp(dots - m)
            p = p / jnp.sum(p, axis=-1, keepdims=True)
            outs.append(jnp.einsum("bqk,bke->bqe", p.astype(bf16), vh.astype(bf16),
                                   preferred_element_type=f32))
        cat = jnp.concatenate(outs, axis=-1).reshape(b * t, heads * e)
        uni = mm(cat, blk["wu"].reshape(heads * e, e)) + blk["bu"]
        y = ln(uni + h2, blk["ln1_g"], blk["ln1_b"])
        hid = jnp.maximum(mm(y, blk["w_ff1"]) + blk["b_ff1"], 0.0)
        ff = mm(hid, blk["w_ff2"]) + blk["b_ff2"]
        h = ln(ff + y, blk["ln2_g"], blk["ln2_b"]).reshape(b, t, e)

    logits = mm(h.reshape(b * t, e), params["w_out"]) + params["b_out"]
    m = jnp.max(logits, axis=-1, keepdims=True)
    s = logits - m
    return (s - jnp.log(jnp.sum(jnp.exp(s), axis=-1, keepdims=True))).reshape(b, t, v)


# --------------------------------------------------------------------------------------
# deterministic parameter init (synthetic; shapes follow the nn.Module __init__)
# --------------------------------------------------------------------------------------
def init_params(key, emb, heads, depth, seq_length, num_tokens):
    def linear(k, fan_in, fan_out):
        kw, kb = jax.random.split(k)
        bound = 1.0 / (fan_in ** 0.5)
        w = jax.random.uniform(kw, (fan_in, fan_out), jnp.float32, -bound, bound)
        bb = jax.random.uniform(kb, (fan_out,), jnp.float32, -bound, bound)
        return w, bb

    keys = jax.random.split(key, depth + 4)
    w_tok, b_tok = linear(keys[0], 4, emb)
    w_pos, b_pos = linear(keys[1], seq_length, emb)
    k_bn = jax.random.split(keys[2], 4)
    bn_tok_g = 1.0 + 0.1 * jax.random.normal(k_bn[0], (emb,), jnp.float32)
    bn_tok_b = 0.1 * jax.random.normal(k_bn[1], (emb,), jnp.float32)
    bn_pos_g = 1.0 + 0.1 * jax.random.normal(k_bn[2], (emb,), jnp.float32)
    bn_pos_b = 0.1 * jax.random.normal(k_bn[3], (emb,), jnp.float32)

    blocks = []
    for d in range(depth):
        kk = jax.random.split(keys[3 + d], 8)
        wq = jax.random.normal(kk[0], (heads, emb, emb), jnp.float32) * (emb ** -0.5)
        wk = jax.random.normal(kk[1], (heads, emb, emb), jnp.float32) * (emb ** -0.5)
        wv = jax.random.normal(kk[2], (heads, emb, emb), jnp.float32) * (emb ** -0.5)
        wu_full, bu = linear(kk[3], heads * emb, emb)
        wu = wu_full.reshape(heads, emb, emb)
        w_ff1, b_ff1 = linear(kk[4], emb, 4 * emb)
        w_ff2, b_ff2 = linear(kk[5], 4 * emb, emb)
        ln1_g = 1.0 + 0.1 * jax.random.normal(kk[6], (emb,), jnp.float32)
        ln1_b = jnp.zeros((emb,), jnp.float32)
        ln2_g = 1.0 + 0.1 * jax.random.normal(kk[7], (emb,), jnp.float32)
        ln2_b = jnp.zeros((emb,), jnp.float32)
        blocks.append(dict(wq=wq, wk=wk, wv=wv, wu=wu, bu=bu,
                           ln1_g=ln1_g, ln1_b=ln1_b, w_ff1=w_ff1, b_ff1=b_ff1,
                           w_ff2=w_ff2, b_ff2=b_ff2, ln2_g=ln2_g, ln2_b=ln2_b))

    w_out, b_out = linear(jax.random.fold_in(key, 999), emb, num_tokens)
    return dict(w_tok=w_tok, b_tok=b_tok, w_pos=w_pos, b_pos=b_pos,
                bn_tok_g=bn_tok_g, bn_tok_b=bn_tok_b,
                bn_pos_g=bn_pos_g, bn_pos_b=bn_pos_b,
                blocks=blocks, w_out=w_out, b_out=b_out)


# --------------------------------------------------------------------------------------
if __name__ == "__main__":
    emb, heads, depth, seq_length, num_tokens = 32, 2, 2, 8, 16
    batch = 2

    key = jax.random.PRNGKey(0)
    k_p, k_x = jax.random.split(key)
    params = init_params(k_p, emb, heads, depth, seq_length, num_tokens)
    # the Linear(4, emb) token embedding implies a float input of shape (b, t, 4)
    x = jax.random.normal(k_x, (batch, seq_length, 4), jnp.float32)

    packed = prepare_params(params, seq_length)   # one-time weight packing (review #6)
    fwd = jax.jit(gtransformer_forward)
    out = jax.block_until_ready(fwd(x, packed))
    ref = jax.block_until_ready(reference_forward(x, params, heads))

    assert out.shape == (batch, seq_length, num_tokens), out.shape
    max_err = float(jnp.max(jnp.abs(out - ref)))
    # tolerance: bf16 MXU operands are mirrored by the reference; the remaining divergence
    # is the kernel's single-pass bf16 BN statistics (review #5) vs the reference's exact
    # f32 statistics, which can reach ~1e-2 at the log-prob output.
    assert max_err < 3e-2, f"mismatch vs pure-JAX reference: {max_err}"
    print("KERNEL_OK")
</pallas_src>

<mosaic_0001>
module attributes {stable_mosaic.version = 11 : i64} {
  func.func @_fused_kernel(%arg0: memref<16x4xf32, #tpu.memory_space<vmem>>, %arg1: memref<4x32xf32, #tpu.memory_space<vmem>>, %arg2: memref<1x32xf32, #tpu.memory_space<vmem>>, %arg3: memref<32x4xf32, #tpu.memory_space<vmem>>, %arg4: memref<4x32xf32, #tpu.memory_space<vmem>>, %arg5: memref<8x32xf32, #tpu.memory_space<vmem>>, %arg6: memref<8x32xf32, #tpu.memory_space<vmem>>, %arg7: memref<8x32xf32, #tpu.memory_space<vmem>>, %arg8: memref<32x32xf32, #tpu.memory_space<vmem>>, %arg9: memref<2x32x192xbf16, #tpu.memory_space<vmem>>, %arg10: memref<2x2x32x32xbf16, #tpu.memory_space<vmem>>, %arg11: memref<2x1x32xf32, #tpu.memory_space<vmem>>, %arg12: memref<2x1x32xf32, #tpu.memory_space<vmem>>, %arg13: memref<2x1x32xf32, #tpu.memory_space<vmem>>, %arg14: memref<2x32x128xbf16, #tpu.memory_space<vmem>>, %arg15: memref<2x1x128xf32, #tpu.memory_space<vmem>>, %arg16: memref<2x128x32xbf16, #tpu.memory_space<vmem>>, %arg17: memref<2x1x32xf32, #tpu.memory_space<vmem>>, %arg18: memref<2x1x32xf32, #tpu.memory_space<vmem>>, %arg19: memref<2x1x32xf32, #tpu.memory_space<vmem>>, %arg20: memref<32x16xbf16, #tpu.memory_space<vmem>>, %arg21: memref<1x16xf32, #tpu.memory_space<vmem>>, %arg22: memref<16x16xf32, #tpu.memory_space<vmem>>) attributes {dimension_semantics = [], scalar_prefetch = 0 : i64, scratch_operands = 0 : i64, tpu.core_type = #tpu.core_type<tc>} {
    %c0 = arith.constant 0 : index
    %c0_0 = arith.constant 0 : index
    %0 = vector.load %arg0[%c0, %c0_0] : memref<16x4xf32, #tpu.memory_space<vmem>>, vector<16x4xf32>
    %c0_1 = arith.constant 0 : index
    %c0_2 = arith.constant 0 : index
    %1 = vector.load %arg1[%c0_1, %c0_2] : memref<4x32xf32, #tpu.memory_space<vmem>>, vector<4x32xf32>
    %c0_3 = arith.constant 0 : index
    %c0_4 = arith.constant 0 : index
    %2 = vector.load %arg2[%c0_3, %c0_4] : memref<1x32xf32, #tpu.memory_space<vmem>>, vector<1x32xf32>
    %3 = vector.extract_strided_slice %0 {offsets = [0, 0], sizes = [16, 1], strides = [1, 1]} : vector<16x4xf32> to vector<16x1xf32>
    %4 = vector.extract_strided_slice %1 {offsets = [0, 0], sizes = [1, 32], strides = [1, 1]} : vector<4x32xf32> to vector<1x32xf32>
    %5 = vector.broadcast %3 : vector<16x1xf32> to vector<16x32xf32>
    %6 = vector.broadcast %4 : vector<1x32xf32> to vector<16x32xf32>
    %7 = arith.mulf %5, %6 : vector<16x32xf32>
    %8 = vector.broadcast %2 : vector<1x32xf32> to vector<16x32xf32>
    %9 = arith.addf %8, %7 : vector<16x32xf32>
    %10 = vector.extract_strided_slice %0 {offsets = [0, 1], sizes = [16, 1], strides = [1, 1]} : vector<16x4xf32> to vector<16x1xf32>
    %11 = vector.extract_strided_slice %1 {offsets = [1, 0], sizes = [1, 32], strides = [1, 1]} : vector<4x32xf32> to vector<1x32xf32>
    %12 = vector.broadcast %10 : vector<16x1xf32> to vector<16x32xf32>
    %13 = vector.broadcast %11 : vector<1x32xf32> to vector<16x32xf32>
    %14 = arith.mulf %12, %13 : vector<16x32xf32>
    %15 = arith.addf %9, %14 : vector<16x32xf32>
    %16 = vector.extract_strided_slice %0 {offsets = [0, 2], sizes = [16, 1], strides = [1, 1]} : vector<16x4xf32> to vector<16x1xf32>
    %17 = vector.extract_strided_slice %1 {offsets = [2, 0], sizes = [1, 32], strides = [1, 1]} : vector<4x32xf32> to vector<1x32xf32>
    %18 = vector.broadcast %16 : vector<16x1xf32> to vector<16x32xf32>
    %19 = vector.broadcast %17 : vector<1x32xf32> to vector<16x32xf32>
    %20 = arith.mulf %18, %19 : vector<16x32xf32>
    %21 = arith.addf %15, %20 : vector<16x32xf32>
    %22 = vector.extract_strided_slice %0 {offsets = [0, 3], sizes = [16, 1], strides = [1, 1]} : vector<16x4xf32> to vector<16x1xf32>
    %23 = vector.extract_strided_slice %1 {offsets = [3, 0], sizes = [1, 32], strides = [1, 1]} : vector<4x32xf32> to vector<1x32xf32>
    %24 = vector.broadcast %22 : vector<16x1xf32> to vector<16x32xf32>
    %25 = vector.broadcast %23 : vector<1x32xf32> to vector<16x32xf32>
    %26 = arith.mulf %24, %25 : vector<16x32xf32>
    %27 = arith.addf %21, %26 : vector<16x32xf32>
    %c0_5 = arith.constant 0 : index
    %c0_6 = arith.constant 0 : index
    %28 = vector.load %arg3[%c0_5, %c0_6] : memref<32x4xf32, #tpu.memory_space<vmem>>, vector<32x4xf32>
    %29 = arith.truncf %28 : vector<32x4xf32> to vector<32x4xbf16>
    %c0_7 = arith.constant 0 : index
    %c0_8 = arith.constant 0 : index
    %30 = vector.load %arg4[%c0_7, %c0_8] : memref<4x32xf32, #tpu.memory_space<vmem>>, vector<4x32xf32>
    %31 = arith.truncf %30 : vector<4x32xf32> to vector<4x32xbf16>
    %32 = vector.shape_cast %27 : vector<16x32xf32> to vector<2x8x32xf32>
    %33 = arith.truncf %27 : vector<16x32xf32> to vector<16x32xbf16>
    %cst = arith.constant dense<0.000000e+00> : vector<16x4xf32>
    %34 = tpu.matmul %33, %29, %cst {dimension_numbers = #tpu.dot_dimension_numbers<[1], [0], [0], [1], [0, 0, 1, 1], [], []>} : vector<16x32xbf16>, vector<32x4xbf16>, vector<16x4xf32> -> vector<16x4xf32>
    %35 = vector.shape_cast %34 : vector<16x4xf32> to vector<2x8x4xf32>
    %cst_9 = arith.constant dense<0.000000e+00> : vector<8x4xf32>
    %36 = vector.multi_reduction <add>, %35, %cst_9 [0] : vector<2x8x4xf32> to vector<8x4xf32>
    %cst_10 = arith.constant 6.250000e-02 : f32
    %37 = vector.broadcast %cst_10 : f32 to vector<8x4xf32>
    %38 = arith.mulf %36, %37 : vector<8x4xf32>
    %39 = arith.truncf %38 : vector<8x4xf32> to vector<8x4xbf16>
    %cst_11 = arith.constant dense<0.000000e+00> : vector<8x32xf32>
    %40 = tpu.matmul %39, %31, %cst_11 {dimension_numbers = #tpu.dot_dimension_numbers<[1], [0], [0], [1], [0, 0, 1, 1], [], []>} : vector<8x4xbf16>, vector<4x32xbf16>, vector<8x32xf32> -> vector<8x32xf32>
    %41 = vector.shape_cast %40 : vector<8x32xf32> to vector<1x8x32xf32>
    %42 = vector.broadcast %41 : vector<1x8x32xf32> to vector<2x8x32xf32>
    %43 = arith.subf %32, %42 : vector<2x8x32xf32>
    %44 = arith.mulf %43, %43 : vector<2x8x32xf32>
    %45 = vector.shape_cast %44 : vector<2x8x32xf32> to vector<16x32xf32>
    %46 = arith.truncf %45 : vector<16x32xf32> to vector<16x32xbf16>
    %cst_12 = arith.constant dense<0.000000e+00> : vector<16x4xf32>
    %47 = tpu.matmul %46, %29, %cst_12 {dimension_numbers = #tpu.dot_dimension_numbers<[1], [0], [0], [1], [0, 0, 1, 1], [], []>} : vector<16x32xbf16>, vector<32x4xbf16>, vector<16x4xf32> -> vector<16x4xf32>
    %48 = vector.shape_cast %47 : vector<16x4xf32> to vector<2x8x4xf32>
    %cst_13 = arith.constant dense<0.000000e+00> : vector<8x4xf32>
    %49 = vector.multi_reduction <add>, %48, %cst_13 [0] : vector<2x8x4xf32> to vector<8x4xf32>
    %cst_14 = arith.constant 6.250000e-02 : f32
    %50 = vector.broadcast %cst_14 : f32 to vector<8x4xf32>
    %51 = arith.mulf %49, %50 : vector<8x4xf32>
    %52 = arith.truncf %51 : vector<8x4xf32> to vector<8x4xbf16>
    %cst_15 = arith.constant dense<0.000000e+00> : vector<8x32xf32>
    %53 = tpu.matmul %52, %31, %cst_15 {dimension_numbers = #tpu.dot_dimension_numbers<[1], [0], [0], [1], [0, 0, 1, 1], [], []>} : vector<8x4xbf16>, vector<4x32xbf16>, vector<8x32xf32> -> vector<8x32xf32>
    %cst_16 = arith.constant 9.99999974E-6 : f32
    %54 = vector.broadcast %cst_16 : f32 to vector<8x32xf32>
    %55 = arith.addf %53, %54 : vector<8x32xf32>
    %56 = math.rsqrt %55 : vector<8x32xf32>
    %57 = vector.shape_cast %56 : vector<8x32xf32> to vector<1x8x32xf32>
    %58 = vector.broadcast %57 : vector<1x8x32xf32> to vector<2x8x32xf32>
    %59 = arith.mulf %43, %58 : vector<2x8x32xf32>
    %c0_17 = arith.constant 0 : index
    %c0_18 = arith.constant 0 : index
    %60 = vector.load %arg5[%c0_17, %c0_18] : memref<8x32xf32, #tpu.memory_space<vmem>>, vector<8x32xf32>
    %61 = vector.shape_cast %60 : vector<8x32xf32> to vector<1x8x32xf32>
    %62 = vector.broadcast %61 : vector<1x8x32xf32> to vector<2x8x32xf32>
    %63 = arith.mulf %59, %62 : vector<2x8x32xf32>
    %c0_19 = arith.constant 0 : index
    %c0_20 = arith.constant 0 : index
    %64 = vector.load %arg6[%c0_19, %c0_20] : memref<8x32xf32, #tpu.memory_space<vmem>>, vector<8x32xf32>
    %65 = vector.shape_cast %64 : vector<8x32xf32> to vector<1x8x32xf32>
    %66 = vector.broadcast %65 : vector<1x8x32xf32> to vector<2x8x32xf32>
    %67 = arith.addf %63, %66 : vector<2x8x32xf32>
    %cst_21 = arith.constant 0.000000e+00 : f32
    %68 = vector.broadcast %cst_21 : f32 to vector<2x8x32xf32>
    %69 = arith.maximumf %67, %68 : vector<2x8x32xf32>
    %c0_22 = arith.constant 0 : index
    %c0_23 = arith.constant 0 : index
    %70 = vector.load %arg7[%c0_22, %c0_23] : memref<8x32xf32, #tpu.memory_space<vmem>>, vector<8x32xf32>
    %71 = vector.shape_cast %70 : vector<8x32xf32> to vector<1x8x32xf32>
    %72 = vector.broadcast %71 : vector<1x8x32xf32> to vector<2x8x32xf32>
    %73 = arith.addf %69, %72 : vector<2x8x32xf32>
    %c0_24 = arith.constant 0 : index
    %c0_25 = arith.constant 0 : index
    %74 = vector.load %arg8[%c0_24, %c0_25] : memref<32x32xf32, #tpu.memory_space<vmem>>, vector<32x32xf32>
    %cst_26 = arith.constant 5.000000e-01 : f32
    %75 = vector.broadcast %cst_26 : f32 to vector<32x32xf32>
    %76 = arith.cmpf ogt, %74, %75 : vector<32x32xf32>
    %77 = vector.shape_cast %73 : vector<2x8x32xf32> to vector<16x32xf32>
    %78 = arith.truncf %77 : vector<16x32xf32> to vector<16x32xbf16>
    %c0_27 = arith.constant 0 : index
    %c0_28 = arith.constant 0 : index
    %c0_29 = arith.constant 0 : index
    %79 = vector.load %arg9[%c0_27, %c0_28, %c0_29] : memref<2x32x192xbf16, #tpu.memory_space<vmem>>, vector<1x32x192xbf16>
    %80 = vector.shape_cast %79 : vector<1x32x192xbf16> to vector<32x192xbf16>
    %cst_30 = arith.constant dense<0.000000e+00> : vector<16x192xf32>
    %81 = tpu.matmul %78, %80, %cst_30 {dimension_numbers = #tpu.dot_dimension_numbers<[1], [0], [0], [1], [0, 0, 1, 1], [], []>} : vector<16x32xbf16>, vector<32x192xbf16>, vector<16x192xf32> -> vector<16x192xf32>
    %82 = vector.extract_strided_slice %81 {offsets = [0, 0], sizes = [16, 32], strides = [1, 1]} : vector<16x192xf32> to vector<16x32xf32>
    %83 = vector.extract_strided_slice %81 {offsets = [0, 32], sizes = [16, 32], strides = [1, 1]} : vector<16x192xf32> to vector<16x32xf32>
    %84 = tpu.concatenate %82, %83 in 0 : vector<16x32xf32>, vector<16x32xf32> -> vector<32x32xf32>
    %85 = arith.truncf %84 : vector<32x32xf32> to vector<32x32xbf16>
    %86 = vector.extract_strided_slice %81 {offsets = [0, 64], sizes = [16, 32], strides = [1, 1]} : vector<16x192xf32> to vector<16x32xf32>
    %87 = vector.extract_strided_slice %81 {offsets = [0, 96], sizes = [16, 32], strides = [1, 1]} : vector<16x192xf32> to vector<16x32xf32>
    %88 = tpu.concatenate %86, %87 in 0 : vector<16x32xf32>, vector<16x32xf32> -> vector<32x32xf32>
    %89 = arith.truncf %88 : vector<32x32xf32> to vector<32x32xbf16>
    %90 = vector.extract_strided_slice %81 {offsets = [0, 128], sizes = [16, 32], strides = [1, 1]} : vector<16x192xf32> to vector<16x32xf32>
    %91 = vector.extract_strided_slice %81 {offsets = [0, 160], sizes = [16, 32], strides = [1, 1]} : vector<16x192xf32> to vector<16x32xf32>
    %92 = tpu.concatenate %90, %91 in 0 : vector<16x32xf32>, vector<16x32xf32> -> vector<32x32xf32>
    %93 = arith.truncf %92 : vector<32x32xf32> to vector<32x32xbf16>
    "tpu.trace_start"() <{level = 10 : i32, message = "qe,ke->qk"}> : () -> ()
    %cst_31 = arith.constant dense<0.000000e+00> : vector<32x32xf32>
    %94 = tpu.matmul %85, %89, %cst_31 {dimension_numbers = #tpu.dot_dimension_numbers<[1], [1], [0], [0], [0, 0, 1, 0], [], []>} : vector<32x32xbf16>, vector<32x32xbf16>, vector<32x32xf32> -> vector<32x32xf32>
    "tpu.trace_stop"() : () -> ()
    %cst_32 = arith.constant 0.176776692 : f32
    %95 = vector.broadcast %cst_32 : f32 to vector<32x32xf32>
    %96 = arith.mulf %94, %95 : vector<32x32xf32>
    %cst_33 = arith.constant -1.000000e+30 : f32
    %97 = vector.broadcast %cst_33 : f32 to vector<32x32xf32>
    %98 = arith.select %76, %96, %97 : vector<32x32xi1>, vector<32x32xf32>
    %cst_34 = arith.constant dense<0xFF800000> : vector<32xf32>
    %99 = vector.multi_reduction <maximumf>, %98, %cst_34 [1] : vector<32x32xf32> to vector<32xf32>
    %100 = vector.shape_cast %99 : vector<32xf32> to vector<32x1xf32>
    %101 = vector.broadcast %100 : vector<32x1xf32> to vector<32x32xf32>
    %102 = arith.subf %98, %101 : vector<32x32xf32>
    %103 = math.exp %102 : vector<32x32xf32>
    %cst_35 = arith.constant dense<0.000000e+00> : vector<32xf32>
    %104 = vector.multi_reduction <add>, %103, %cst_35 [1] : vector<32x32xf32> to vector<32xf32>
    %105 = vector.shape_cast %104 : vector<32xf32> to vector<32x1xf32>
    %106 = vector.broadcast %105 : vector<32x1xf32> to vector<32x32xf32>
    %107 = arith.divf %103, %106 : vector<32x32xf32>
    %108 = arith.truncf %107 : vector<32x32xf32> to vector<32x32xbf16>
    %cst_36 = arith.constant dense<0.000000e+00> : vector<32x32xf32>
    %109 = tpu.matmul %108, %93, %cst_36 {dimension_numbers = #tpu.dot_dimension_numbers<[1], [0], [0], [1], [0, 0, 1, 1], [], []>} : vector<32x32xbf16>, vector<32x32xbf16>, vector<32x32xf32> -> vector<32x32xf32>
    %c0_37 = arith.constant 0 : index
    %c0_38 = arith.constant 0 : index
    %c0_39 = arith.constant 0 : index
    %c0_40 = arith.constant 0 : index
    %110 = vector.load %arg10[%c0_37, %c0_38, %c0_39, %c0_40] : memref<2x2x32x32xbf16, #tpu.memory_space<vmem>>, vector<1x2x32x32xbf16>
    %111 = vector.shape_cast %110 : vector<1x2x32x32xbf16> to vector<2x32x32xbf16>
    %c0_41 = arith.constant 0 : index
    %c0_42 = arith.constant 0 : index
    %c0_43 = arith.constant 0 : index
    %112 = vector.load %arg11[%c0_41, %c0_42, %c0_43] : memref<2x1x32xf32, #tpu.memory_space<vmem>>, vector<1x1x32xf32>
    %113 = vector.shape_cast %112 : vector<1x1x32xf32> to vector<1x32xf32>
    %114 = vector.extract_strided_slice %109 {offsets = [0, 0], sizes = [16, 32], strides = [1, 1]} : vector<32x32xf32> to vector<16x32xf32>
    %115 = arith.truncf %114 : vector<16x32xf32> to vector<16x32xbf16>
    %116 = vector.extract_strided_slice %111 {offsets = [0, 0, 0], sizes = [1, 32, 32], strides = [1, 1, 1]} : vector<2x32x32xbf16> to vector<1x32x32xbf16>
    %117 = vector.shape_cast %116 : vector<1x32x32xbf16> to vector<32x32xbf16>
    %cst_44 = arith.constant dense<0.000000e+00> : vector<16x32xf32>
    %118 = tpu.matmul %115, %117, %cst_44 {dimension_numbers = #tpu.dot_dimension_numbers<[1], [0], [0], [1], [0, 0, 1, 1], [], []>} : vector<16x32xbf16>, vector<32x32xbf16>, vector<16x32xf32> -> vector<16x32xf32>
    %119 = vector.broadcast %113 : vector<1x32xf32> to vector<16x32xf32>
    %120 = arith.addf %119, %118 : vector<16x32xf32>
    %121 = vector.extract_strided_slice %109 {offsets = [16, 0], sizes = [16, 32], strides = [1, 1]} : vector<32x32xf32> to vector<16x32xf32>
    %122 = arith.truncf %121 : vector<16x32xf32> to vector<16x32xbf16>
    %123 = vector.extract_strided_slice %111 {offsets = [1, 0, 0], sizes = [1, 32, 32], strides = [1, 1, 1]} : vector<2x32x32xbf16> to vector<1x32x32xbf16>
    %124 = vector.shape_cast %123 : vector<1x32x32xbf16> to vector<32x32xbf16>
    %cst_45 = arith.constant dense<0.000000e+00> : vector<16x32xf32>
    %125 = tpu.matmul %122, %124, %cst_45 {dimension_numbers = #tpu.dot_dimension_numbers<[1], [0], [0], [1], [0, 0, 1, 1], [], []>} : vector<16x32xbf16>, vector<32x32xbf16>, vector<16x32xf32> -> vector<16x32xf32>
    %126 = arith.addf %120, %125 : vector<16x32xf32>
    %127 = arith.addf %126, %77 : vector<16x32xf32>
    %c0_46 = arith.constant 0 : index
    %c0_47 = arith.constant 0 : index
    %c0_48 = arith.constant 0 : index
    %128 = vector.load %arg12[%c0_46, %c0_47, %c0_48] : memref<2x1x32xf32, #tpu.memory_space<vmem>>, vector<1x1x32xf32>
    %129 = vector.shape_cast %128 : vector<1x1x32xf32> to vector<1x32xf32>
    %c0_49 = arith.constant 0 : index
    %c0_50 = arith.constant 0 : index
    %c0_51 = arith.constant 0 : index
    %130 = vector.load %arg13[%c0_49, %c0_50, %c0_51] : memref<2x1x32xf32, #tpu.memory_space<vmem>>, vector<1x1x32xf32>
    %131 = vector.shape_cast %130 : vector<1x1x32xf32> to vector<1x32xf32>
    %cst_52 = arith.constant dense<0.000000e+00> : vector<16xf32>
    %132 = vector.multi_reduction <add>, %127, %cst_52 [1] : vector<16x32xf32> to vector<16xf32>
    %133 = vector.shape_cast %132 : vector<16xf32> to vector<16x1xf32>
    %cst_53 = arith.constant 3.200000e+01 : f32
    %134 = vector.broadcast %cst_53 : f32 to vector<16x1xf32>
    %135 = arith.divf %133, %134 : vector<16x1xf32>
    %136 = vector.broadcast %135 : vector<16x1xf32> to vector<16x32xf32>
    %137 = arith.subf %127, %136 : vector<16x32xf32>
    %138 = arith.mulf %137, %137 : vector<16x32xf32>
    %cst_54 = arith.constant dense<0.000000e+00> : vector<16xf32>
    %139 = vector.multi_reduction <add>, %138, %cst_54 [1] : vector<16x32xf32> to vector<16xf32>
    %140 = vector.shape_cast %139 : vector<16xf32> to vector<16x1xf32>
    %cst_55 = arith.constant 3.200000e+01 : f32
    %141 = vector.broadcast %cst_55 : f32 to vector<16x1xf32>
    %142 = arith.divf %140, %141 : vector<16x1xf32>
    %cst_56 = arith.constant 9.99999974E-6 : f32
    %143 = vector.broadcast %cst_56 : f32 to vector<16x1xf32>
    %144 = arith.addf %142, %143 : vector<16x1xf32>
    %145 = math.rsqrt %144 : vector<16x1xf32>
    %146 = vector.broadcast %145 : vector<16x1xf32> to vector<16x32xf32>
    %147 = arith.mulf %137, %146 : vector<16x32xf32>
    %148 = vector.broadcast %129 : vector<1x32xf32> to vector<16x32xf32>
    %149 = arith.mulf %147, %148 : vector<16x32xf32>
    %150 = vector.broadcast %131 : vector<1x32xf32> to vector<16x32xf32>
    %151 = arith.addf %149, %150 : vector<16x32xf32>
    %152 = arith.truncf %151 : vector<16x32xf32> to vector<16x32xbf16>
    %c0_57 = arith.constant 0 : index
    %c0_58 = arith.constant 0 : index
    %c0_59 = arith.constant 0 : index
    %153 = vector.load %arg14[%c0_57, %c0_58, %c0_59] : memref<2x32x128xbf16, #tpu.memory_space<vmem>>, vector<1x32x128xbf16>
    %154 = vector.shape_cast %153 : vector<1x32x128xbf16> to vector<32x128xbf16>
    %cst_60 = arith.constant dense<0.000000e+00> : vector<16x128xf32>
    %155 = tpu.matmul %152, %154, %cst_60 {dimension_numbers = #tpu.dot_dimension_numbers<[1], [0], [0], [1], [0, 0, 1, 1], [], []>} : vector<16x32xbf16>, vector<32x128xbf16>, vector<16x128xf32> -> vector<16x128xf32>
    %c0_61 = arith.constant 0 : index
    %c0_62 = arith.constant 0 : index
    %c0_63 = arith.constant 0 : index
    %156 = vector.load %arg15[%c0_61, %c0_62, %c0_63] : memref<2x1x128xf32, #tpu.memory_space<vmem>>, vector<1x1x128xf32>
    %157 = vector.shape_cast %156 : vector<1x1x128xf32> to vector<1x128xf32>
    %158 = vector.broadcast %157 : vector<1x128xf32> to vector<16x128xf32>
    %159 = arith.addf %155, %158 : vector<16x128xf32>
    %cst_64 = arith.constant 0.000000e+00 : f32
    %160 = vector.broadcast %cst_64 : f32 to vector<16x128xf32>
    %161 = arith.maximumf %159, %160 : vector<16x128xf32>
    %162 = arith.truncf %161 : vector<16x128xf32> to vector<16x128xbf16>
    %c0_65 = arith.constant 0 : index
    %c0_66 = arith.constant 0 : index
    %c0_67 = arith.constant 0 : index
    %163 = vector.load %arg16[%c0_65, %c0_66, %c0_67] : memref<2x128x32xbf16, #tpu.memory_space<vmem>>, vector<1x128x32xbf16>
    %164 = vector.shape_cast %163 : vector<1x128x32xbf16> to vector<128x32xbf16>
    %cst_68 = arith.constant dense<0.000000e+00> : vector<16x32xf32>
    %165 = tpu.matmul %162, %164, %cst_68 {dimension_numbers = #tpu.dot_dimension_numbers<[1], [0], [0], [1], [0, 0, 1, 1], [], []>} : vector<16x128xbf16>, vector<128x32xbf16>, vector<16x32xf32> -> vector<16x32xf32>
    %c0_69 = arith.constant 0 : index
    %c0_70 = arith.constant 0 : index
    %c0_71 = arith.constant 0 : index
    %166 = vector.load %arg17[%c0_69, %c0_70, %c0_71] : memref<2x1x32xf32, #tpu.memory_space<vmem>>, vector<1x1x32xf32>
    %167 = vector.shape_cast %166 : vector<1x1x32xf32> to vector<1x32xf32>
    %168 = vector.broadcast %167 : vector<1x32xf32> to vector<16x32xf32>
    %169 = arith.addf %165, %168 : vector<16x32xf32>
    %170 = arith.addf %169, %151 : vector<16x32xf32>
    %c0_72 = arith.constant 0 : index
    %c0_73 = arith.constant 0 : index
    %c0_74 = arith.constant 0 : index
    %171 = vector.load %arg18[%c0_72, %c0_73, %c0_74] : memref<2x1x32xf32, #tpu.memory_space<vmem>>, vector<1x1x32xf32>
    %172 = vector.shape_cast %171 : vector<1x1x32xf32> to vector<1x32xf32>
    %c0_75 = arith.constant 0 : index
    %c0_76 = arith.constant 0 : index
    %c0_77 = arith.constant 0 : index
    %173 = vector.load %arg19[%c0_75, %c0_76, %c0_77] : memref<2x1x32xf32, #tpu.memory_space<vmem>>, vector<1x1x32xf32>
    %174 = vector.shape_cast %173 : vector<1x1x32xf32> to vector<1x32xf32>
    %cst_78 = arith.constant dense<0.000000e+00> : vector<16xf32>
    %175 = vector.multi_reduction <add>, %170, %cst_78 [1] : vector<16x32xf32> to vector<16xf32>
    %176 = vector.shape_cast %175 : vector<16xf32> to vector<16x1xf32>
    %cst_79 = arith.constant 3.200000e+01 : f32
    %177 = vector.broadcast %cst_79 : f32 to vector<16x1xf32>
    %178 = arith.divf %176, %177 : vector<16x1xf32>
    %179 = vector.broadcast %178 : vector<16x1xf32> to vector<16x32xf32>
    %180 = arith.subf %170, %179 : vector<16x32xf32>
    %181 = arith.mulf %180, %180 : vector<16x32xf32>
    %cst_80 = arith.constant dense<0.000000e+00> : vector<16xf32>
    %182 = vector.multi_reduction <add>, %181, %cst_80 [1] : vector<16x32xf32> to vector<16xf32>
    %183 = vector.shape_cast %182 : vector<16xf32> to vector<16x1xf32>
    %cst_81 = arith.constant 3.200000e+01 : f32
    %184 = vector.broadcast %cst_81 : f32 to vector<16x1xf32>
    %185 = arith.divf %183, %184 : vector<16x1xf32>
    %cst_82 = arith.constant 9.99999974E-6 : f32
    %186 = vector.broadcast %cst_82 : f32 to vector<16x1xf32>
    %187 = arith.addf %185, %186 : vector<16x1xf32>
    %188 = math.rsqrt %187 : vector<16x1xf32>
    %189 = vector.broadcast %188 : vector<16x1xf32> to vector<16x32xf32>
    %190 = arith.mulf %180, %189 : vector<16x32xf32>
    %191 = vector.broadcast %172 : vector<1x32xf32> to vector<16x32xf32>
    %192 = arith.mulf %190, %191 : vector<16x32xf32>
    %193 = vector.broadcast %174 : vector<1x32xf32> to vector<16x32xf32>
    %194 = arith.addf %192, %193 : vector<16x32xf32>
    %195 = vector.shape_cast %194 : vector<16x32xf32> to vector<2x8x32xf32>
    %196 = vector.shape_cast %195 : vector<2x8x32xf32> to vector<16x32xf32>
    %197 = arith.truncf %196 : vector<16x32xf32> to vector<16x32xbf16>
    %c1 = arith.constant 1 : index
    %c0_83 = arith.constant 0 : index
    %c0_84 = arith.constant 0 : index
    %198 = vector.load %arg9[%c1, %c0_83, %c0_84] : memref<2x32x192xbf16, #tpu.memory_space<vmem>>, vector<1x32x192xbf16>
    %199 = vector.shape_cast %198 : vector<1x32x192xbf16> to vector<32x192xbf16>
    %cst_85 = arith.constant dense<0.000000e+00> : vector<16x192xf32>
    %200 = tpu.matmul %197, %199, %cst_85 {dimension_numbers = #tpu.dot_dimension_numbers<[1], [0], [0], [1], [0, 0, 1, 1], [], []>} : vector<16x32xbf16>, vector<32x192xbf16>, vector<16x192xf32> -> vector<16x192xf32>
    %201 = vector.extract_strided_slice %200 {offsets = [0, 0], sizes = [16, 32], strides = [1, 1]} : vector<16x192xf32> to vector<16x32xf32>
    %202 = vector.extract_strided_slice %200 {offsets = [0, 32], sizes = [16, 32], strides = [1, 1]} : vector<16x192xf32> to vector<16x32xf32>
    %203 = tpu.concatenate %201, %202 in 0 : vector<16x32xf32>, vector<16x32xf32> -> vector<32x32xf32>
    %204 = arith.truncf %203 : vector<32x32xf32> to vector<32x32xbf16>
    %205 = vector.extract_strided_slice %200 {offsets = [0, 64], sizes = [16, 32], strides = [1, 1]} : vector<16x192xf32> to vector<16x32xf32>
    %206 = vector.extract_strided_slice %200 {offsets = [0, 96], sizes = [16, 32], strides = [1, 1]} : vector<16x192xf32> to vector<16x32xf32>
    %207 = tpu.concatenate %205, %206 in 0 : vector<16x32xf32>, vector<16x32xf32> -> vector<32x32xf32>
    %208 = arith.truncf %207 : vector<32x32xf32> to vector<32x32xbf16>
    %209 = vector.extract_strided_slice %200 {offsets = [0, 128], sizes = [16, 32], strides = [1, 1]} : vector<16x192xf32> to vector<16x32xf32>
    %210 = vector.extract_strided_slice %200 {offsets = [0, 160], sizes = [16, 32], strides = [1, 1]} : vector<16x192xf32> to vector<16x32xf32>
    %211 = tpu.concatenate %209, %210 in 0 : vector<16x32xf32>, vector<16x32xf32> -> vector<32x32xf32>
    %212 = arith.truncf %211 : vector<32x32xf32> to vector<32x32xbf16>
    "tpu.trace_start"() <{level = 10 : i32, message = "qe,ke->qk"}> : () -> ()
    %cst_86 = arith.constant dense<0.000000e+00> : vector<32x32xf32>
    %213 = tpu.matmul %204, %208, %cst_86 {dimension_numbers = #tpu.dot_dimension_numbers<[1], [1], [0], [0], [0, 0, 1, 0], [], []>} : vector<32x32xbf16>, vector<32x32xbf16>, vector<32x32xf32> -> vector<32x32xf32>
    "tpu.trace_stop"() : () -> ()
    %cst_87 = arith.constant 0.176776692 : f32
    %214 = vector.broadcast %cst_87 : f32 to vector<32x32xf32>
    %215 = arith.mulf %213, %214 : vector<32x32xf32>
    %cst_88 = arith.constant -1.000000e+30 : f32
    %216 = vector.broadcast %cst_88 : f32 to vector<32x32xf32>
    %217 = arith.select %76, %215, %216 : vector<32x32xi1>, vector<32x32xf32>
    %cst_89 = arith.constant dense<0xFF800000> : vector<32xf32>
    %218 = vector.multi_reduction <maximumf>, %217, %cst_89 [1] : vector<32x32xf32> to vector<32xf32>
    %219 = vector.shape_cast %218 : vector<32xf32> to vector<32x1xf32>
    %220 = vector.broadcast %219 : vector<32x1xf32> to vector<32x32xf32>
    %221 = arith.subf %217, %220 : vector<32x32xf32>
    %222 = math.exp %221 : vector<32x32xf32>
    %cst_90 = arith.constant dense<0.000000e+00> : vector<32xf32>
    %223 = vector.multi_reduction <add>, %222, %cst_90 [1] : vector<32x32xf32> to vector<32xf32>
    %224 = vector.shape_cast %223 : vector<32xf32> to vector<32x1xf32>
    %225 = vector.broadcast %224 : vector<32x1xf32> to vector<32x32xf32>
    %226 = arith.divf %222, %225 : vector<32x32xf32>
    %227 = arith.truncf %226 : vector<32x32xf32> to vector<32x32xbf16>
    %cst_91 = arith.constant dense<0.000000e+00> : vector<32x32xf32>
    %228 = tpu.matmul %227, %212, %cst_91 {dimension_numbers = #tpu.dot_dimension_numbers<[1], [0], [0], [1], [0, 0, 1, 1], [], []>} : vector<32x32xbf16>, vector<32x32xbf16>, vector<32x32xf32> -> vector<32x32xf32>
    %c1_92 = arith.constant 1 : index
    %c0_93 = arith.constant 0 : index
    %c0_94 = arith.constant 0 : index
    %c0_95 = arith.constant 0 : index
    %229 = vector.load %arg10[%c1_92, %c0_93, %c0_94, %c0_95] : memref<2x2x32x32xbf16, #tpu.memory_space<vmem>>, vector<1x2x32x32xbf16>
    %230 = vector.shape_cast %229 : vector<1x2x32x32xbf16> to vector<2x32x32xbf16>
    %c1_96 = arith.constant 1 : index
    %c0_97 = arith.constant 0 : index
    %c0_98 = arith.constant 0 : index
    %231 = vector.load %arg11[%c1_96, %c0_97, %c0_98] : memref<2x1x32xf32, #tpu.memory_space<vmem>>, vector<1x1x32xf32>
    %232 = vector.shape_cast %231 : vector<1x1x32xf32> to vector<1x32xf32>
    %233 = vector.extract_strided_slice %228 {offsets = [0, 0], sizes = [16, 32], strides = [1, 1]} : vector<32x32xf32> to vector<16x32xf32>
    %234 = arith.truncf %233 : vector<16x32xf32> to vector<16x32xbf16>
    %235 = vector.extract_strided_slice %230 {offsets = [0, 0, 0], sizes = [1, 32, 32], strides = [1, 1, 1]} : vector<2x32x32xbf16> to vector<1x32x32xbf16>
    %236 = vector.shape_cast %235 : vector<1x32x32xbf16> to vector<32x32xbf16>
    %cst_99 = arith.constant dense<0.000000e+00> : vector<16x32xf32>
    %237 = tpu.matmul %234, %236, %cst_99 {dimension_numbers = #tpu.dot_dimension_numbers<[1], [0], [0], [1], [0, 0, 1, 1], [], []>} : vector<16x32xbf16>, vector<32x32xbf16>, vector<16x32xf32> -> vector<16x32xf32>
    %238 = vector.broadcast %232 : vector<1x32xf32> to vector<16x32xf32>
    %239 = arith.addf %238, %237 : vector<16x32xf32>
    %240 = vector.extract_strided_slice %228 {offsets = [16, 0], sizes = [16, 32], strides = [1, 1]} : vector<32x32xf32> to vector<16x32xf32>
    %241 = arith.truncf %240 : vector<16x32xf32> to vector<16x32xbf16>
    %242 = vector.extract_strided_slice %230 {offsets = [1, 0, 0], sizes = [1, 32, 32], strides = [1, 1, 1]} : vector<2x32x32xbf16> to vector<1x32x32xbf16>
    %243 = vector.shape_cast %242 : vector<1x32x32xbf16> to vector<32x32xbf16>
    %cst_100 = arith.constant dense<0.000000e+00> : vector<16x32xf32>
    %244 = tpu.matmul %241, %243, %cst_100 {dimension_numbers = #tpu.dot_dimension_numbers<[1], [0], [0], [1], [0, 0, 1, 1], [], []>} : vector<16x32xbf16>, vector<32x32xbf16>, vector<16x32xf32> -> vector<16x32xf32>
    %245 = arith.addf %239, %244 : vector<16x32xf32>
    %246 = arith.addf %245, %196 : vector<16x32xf32>
    %c1_101 = arith.constant 1 : index
    %c0_102 = arith.constant 0 : index
    %c0_103 = arith.constant 0 : index
    %247 = vector.load %arg12[%c1_101, %c0_102, %c0_103] : memref<2x1x32xf32, #tpu.memory_space<vmem>>, vector<1x1x32xf32>
    %248 = vector.shape_cast %247 : vector<1x1x32xf32> to vector<1x32xf32>
    %c1_104 = arith.constant 1 : index
    %c0_105 = arith.constant 0 : index
    %c0_106 = arith.constant 0 : index
    %249 = vector.load %arg13[%c1_104, %c0_105, %c0_106] : memref<2x1x32xf32, #tpu.memory_space<vmem>>, vector<1x1x32xf32>
    %250 = vector.shape_cast %249 : vector<1x1x32xf32> to vector<1x32xf32>
    %cst_107 = arith.constant dense<0.000000e+00> : vector<16xf32>
    %251 = vector.multi_reduction <add>, %246, %cst_107 [1] : vector<16x32xf32> to vector<16xf32>
    %252 = vector.shape_cast %251 : vector<16xf32> to vector<16x1xf32>
    %cst_108 = arith.constant 3.200000e+01 : f32
    %253 = vector.broadcast %cst_108 : f32 to vector<16x1xf32>
    %254 = arith.divf %252, %253 : vector<16x1xf32>
    %255 = vector.broadcast %254 : vector<16x1xf32> to vector<16x32xf32>
    %256 = arith.subf %246, %255 : vector<16x32xf32>
    %257 = arith.mulf %256, %256 : vector<16x32xf32>
    %cst_109 = arith.constant dense<0.000000e+00> : vector<16xf32>
    %258 = vector.multi_reduction <add>, %257, %cst_109 [1] : vector<16x32xf32> to vector<16xf32>
    %259 = vector.shape_cast %258 : vector<16xf32> to vector<16x1xf32>
    %cst_110 = arith.constant 3.200000e+01 : f32
    %260 = vector.broadcast %cst_110 : f32 to vector<16x1xf32>
    %261 = arith.divf %259, %260 : vector<16x1xf32>
    %cst_111 = arith.constant 9.99999974E-6 : f32
    %262 = vector.broadcast %cst_111 : f32 to vector<16x1xf32>
    %263 = arith.addf %261, %262 : vector<16x1xf32>
    %264 = math.rsqrt %263 : vector<16x1xf32>
    %265 = vector.broadcast %264 : vector<16x1xf32> to vector<16x32xf32>
    %266 = arith.mulf %256, %265 : vector<16x32xf32>
    %267 = vector.broadcast %248 : vector<1x32xf32> to vector<16x32xf32>
    %268 = arith.mulf %266, %267 : vector<16x32xf32>
    %269 = vector.broadcast %250 : vector<1x32xf32> to vector<16x32xf32>
    %270 = arith.addf %268, %269 : vector<16x32xf32>
    %271 = arith.truncf %270 : vector<16x32xf32> to vector<16x32xbf16>
    %c1_112 = arith.constant 1 : index
    %c0_113 = arith.constant 0 : index
    %c0_114 = arith.constant 0 : index
    %272 = vector.load %arg14[%c1_112, %c0_113, %c0_114] : memref<2x32x128xbf16, #tpu.memory_space<vmem>>, vector<1x32x128xbf16>
    %273 = vector.shape_cast %272 : vector<1x32x128xbf16> to vector<32x128xbf16>
    %cst_115 = arith.constant dense<0.000000e+00> : vector<16x128xf32>
    %274 = tpu.matmul %271, %273, %cst_115 {dimension_numbers = #tpu.dot_dimension_numbers<[1], [0], [0], [1], [0, 0, 1, 1], [], []>} : vector<16x32xbf16>, vector<32x128xbf16>, vector<16x128xf32> -> vector<16x128xf32>
    %c1_116 = arith.constant 1 : index
    %c0_117 = arith.constant 0 : index
    %c0_118 = arith.constant 0 : index
    %275 = vector.load %arg15[%c1_116, %c0_117, %c0_118] : memref<2x1x128xf32, #tpu.memory_space<vmem>>, vector<1x1x128xf32>
    %276 = vector.shape_cast %275 : vector<1x1x128xf32> to vector<1x128xf32>
    %277 = vector.broadcast %276 : vector<1x128xf32> to vector<16x128xf32>
    %278 = arith.addf %274, %277 : vector<16x128xf32>
    %cst_119 = arith.constant 0.000000e+00 : f32
    %279 = vector.broadcast %cst_119 : f32 to vector<16x128xf32>
    %280 = arith.maximumf %278, %279 : vector<16x128xf32>
    %281 = arith.truncf %280 : vector<16x128xf32> to vector<16x128xbf16>
    %c1_120 = arith.constant 1 : index
    %c0_121 = arith.constant 0 : index
    %c0_122 = arith.constant 0 : index
    %282 = vector.load %arg16[%c1_120, %c0_121, %c0_122] : memref<2x128x32xbf16, #tpu.memory_space<vmem>>, vector<1x128x32xbf16>
    %283 = vector.shape_cast %282 : vector<1x128x32xbf16> to vector<128x32xbf16>
    %cst_123 = arith.constant dense<0.000000e+00> : vector<16x32xf32>
    %284 = tpu.matmul %281, %283, %cst_123 {dimension_numbers = #tpu.dot_dimension_numbers<[1], [0], [0], [1], [0, 0, 1, 1], [], []>} : vector<16x128xbf16>, vector<128x32xbf16>, vector<16x32xf32> -> vector<16x32xf32>
    %c1_124 = arith.constant 1 : index
    %c0_125 = arith.constant 0 : index
    %c0_126 = arith.constant 0 : index
    %285 = vector.load %arg17[%c1_124, %c0_125, %c0_126] : memref<2x1x32xf32, #tpu.memory_space<vmem>>, vector<1x1x32xf32>
    %286 = vector.shape_cast %285 : vector<1x1x32xf32> to vector<1x32xf32>
    %287 = vector.broadcast %286 : vector<1x32xf32> to vector<16x32xf32>
    %288 = arith.addf %284, %287 : vector<16x32xf32>
    %289 = arith.addf %288, %270 : vector<16x32xf32>
    %c1_127 = arith.constant 1 : index
    %c0_128 = arith.constant 0 : index
    %c0_129 = arith.constant 0 : index
    %290 = vector.load %arg18[%c1_127, %c0_128, %c0_129] : memref<2x1x32xf32, #tpu.memory_space<vmem>>, vector<1x1x32xf32>
    %291 = vector.shape_cast %290 : vector<1x1x32xf32> to vector<1x32xf32>
    %c1_130 = arith.constant 1 : index
    %c0_131 = arith.constant 0 : index
    %c0_132 = arith.constant 0 : index
    %292 = vector.load %arg19[%c1_130, %c0_131, %c0_132] : memref<2x1x32xf32, #tpu.memory_space<vmem>>, vector<1x1x32xf32>
    %293 = vector.shape_cast %292 : vector<1x1x32xf32> to vector<1x32xf32>
    %cst_133 = arith.constant dense<0.000000e+00> : vector<16xf32>
    %294 = vector.multi_reduction <add>, %289, %cst_133 [1] : vector<16x32xf32> to vector<16xf32>
    %295 = vector.shape_cast %294 : vector<16xf32> to vector<16x1xf32>
    %cst_134 = arith.constant 3.200000e+01 : f32
    %296 = vector.broadcast %cst_134 : f32 to vector<16x1xf32>
    %297 = arith.divf %295, %296 : vector<16x1xf32>
    %298 = vector.broadcast %297 : vector<16x1xf32> to vector<16x32xf32>
    %299 = arith.subf %289, %298 : vector<16x32xf32>
    %300 = arith.mulf %299, %299 : vector<16x32xf32>
    %cst_135 = arith.constant dense<0.000000e+00> : vector<16xf32>
    %301 = vector.multi_reduction <add>, %300, %cst_135 [1] : vector<16x32xf32> to vector<16xf32>
    %302 = vector.shape_cast %301 : vector<16xf32> to vector<16x1xf32>
    %cst_136 = arith.constant 3.200000e+01 : f32
    %303 = vector.broadcast %cst_136 : f32 to vector<16x1xf32>
    %304 = arith.divf %302, %303 : vector<16x1xf32>
    %cst_137 = arith.constant 9.99999974E-6 : f32
    %305 = vector.broadcast %cst_137 : f32 to vector<16x1xf32>
    %306 = arith.addf %304, %305 : vector<16x1xf32>
    %307 = math.rsqrt %306 : vector<16x1xf32>
    %308 = vector.broadcast %307 : vector<16x1xf32> to vector<16x32xf32>
    %309 = arith.mulf %299, %308 : vector<16x32xf32>
    %310 = vector.broadcast %291 : vector<1x32xf32> to vector<16x32xf32>
    %311 = arith.mulf %309, %310 : vector<16x32xf32>
    %312 = vector.broadcast %293 : vector<1x32xf32> to vector<16x32xf32>
    %313 = arith.addf %311, %312 : vector<16x32xf32>
    %314 = vector.shape_cast %313 : vector<16x32xf32> to vector<2x8x32xf32>
    %315 = vector.shape_cast %314 : vector<2x8x32xf32> to vector<16x32xf32>
    %316 = arith.truncf %315 : vector<16x32xf32> to vector<16x32xbf16>
    %c0_138 = arith.constant 0 : index
    %c0_139 = arith.constant 0 : index
    %317 = vector.load %arg20[%c0_138, %c0_139] : memref<32x16xbf16, #tpu.memory_space<vmem>>, vector<32x16xbf16>
    %cst_140 = arith.constant dense<0.000000e+00> : vector<16x16xf32>
    %318 = tpu.matmul %316, %317, %cst_140 {dimension_numbers = #tpu.dot_dimension_numbers<[1], [0], [0], [1], [0, 0, 1, 1], [], []>} : vector<16x32xbf16>, vector<32x16xbf16>, vector<16x16xf32> -> vector<16x16xf32>
    %c0_141 = arith.constant 0 : index
    %c0_142 = arith.constant 0 : index
    %319 = vector.load %arg21[%c0_141, %c0_142] : memref<1x16xf32, #tpu.memory_space<vmem>>, vector<1x16xf32>
    %320 = vector.broadcast %319 : vector<1x16xf32> to vector<16x16xf32>
    %321 = arith.addf %318, %320 : vector<16x16xf32>
    %cst_143 = arith.constant dense<0xFF800000> : vector<16xf32>
    %322 = vector.multi_reduction <maximumf>, %321, %cst_143 [1] : vector<16x16xf32> to vector<16xf32>
    %323 = vector.shape_cast %322 : vector<16xf32> to vector<16x1xf32>
    %324 = vector.broadcast %323 : vector<16x1xf32> to vector<16x16xf32>
    %325 = arith.subf %321, %324 : vector<16x16xf32>
    %326 = math.exp %325 : vector<16x16xf32>
    %cst_144 = arith.constant dense<0.000000e+00> : vector<16xf32>
    %327 = vector.multi_reduction <add>, %326, %cst_144 [1] : vector<16x16xf32> to vector<16xf32>
    %328 = vector.shape_cast %327 : vector<16xf32> to vector<16x1xf32>
    %329 = math.log %328 : vector<16x1xf32>
    %330 = vector.broadcast %329 : vector<16x1xf32> to vector<16x16xf32>
    %331 = arith.subf %325, %330 : vector<16x16xf32>
    %c0_145 = arith.constant 0 : index
    %c0_146 = arith.constant 0 : index
    %332 = vector.load %arg22[%c0_145, %c0_146] : memref<16x16xf32, #tpu.memory_space<vmem>>, vector<16x16xf32>
    tpu.vector_store %arg22[%c0_145, %c0_146], %331 {strides = array<i32>} : memref<16x16xf32, #tpu.memory_space<vmem>>, vector<16x16xf32>,
    return
  }
}

</mosaic_0001>

<bundles_post_ra>
// kernel: gtransformer_forward.1
= control target key start
LH: loop header
LB: loop body
LE: loop exit
PB: predicated region body
PF: predicated region fallthrough
CT: control target
= control target key end

     0   :  { %s2903_s0 = inlined_call_operand.vmem [shape: f32[16,4], index: 0, kind: input, shape index: {}]   ;;  %s2904_s1 = inlined_call_operand.vmem [shape: f32[4,32], index: 1, kind: input, shape index: {}]   ;;  %s2905_s2 = inlined_call_operand.vmem [shape: f32[1,32], index: 2, kind: input, shape index: {}]   ;;  %s2906_s3 = inlined_call_operand.vmem [shape: f32[32,4], index: 3, kind: input, shape index: {}]   ;;  %s2907_s4 = inlined_call_operand.vmem [shape: f32[4,32], index: 4, kind: input, shape index: {}]   ;;  %s2908_s5 = inlined_call_operand.vmem [shape: f32[8,32], index: 5, kind: input, shape index: {}]   ;;  %s2909_s6 = inlined_call_operand.vmem [shape: f32[8,32], index: 6, kind: input, shape index: {}]   ;;  %s2910_s7 = inlined_call_operand.vmem [shape: f32[8,32], index: 7, kind: input, shape index: {}]   ;;  %s2911_s8 = inlined_call_operand.vmem [shape: f32[32,32], index: 8, kind: input, shape index: {}]   ;;  %s2912_s9 = inlined_call_operand.vmem [shape: bf16[2,32,192], index: 9, kind: input, shape index: {}]   ;;  %s2913_s10 = inlined_call_operand.vmem [shape: bf16[2,2,32,32], index: 10, kind: input, shape index: {}]   ;;  %s2914_s11 = inlined_call_operand.vmem [shape: f32[2,1,32], index: 11, kind: input, shape index: {}]   ;;  %s2915_s12 = inlined_call_operand.vmem [shape: f32[2,1,32], index: 12, kind: input, shape index: {}]   ;;  %s2916_s13 = inlined_call_operand.vmem [shape: f32[2,1,32], index: 13, kind: input, shape index: {}]   ;;  %s2917_s14 = inlined_call_operand.vmem [shape: bf16[2,32,128], index: 14, kind: input, shape index: {}]   ;;  %s2918_s15 = inlined_call_operand.vmem [shape: f32[2,1,128], index: 15, kind: input, shape index: {}]   ;;  %s2919_s16 = inlined_call_operand.vmem [shape: bf16[2,128,32], index: 16, kind: input, shape index: {}]   ;;  %s2920_s17 = inlined_call_operand.vmem [shape: f32[2,1,32], index: 17, kind: input, shape index: {}]   ;;  %s2921_s18 = inlined_call_operand.vmem [shape: f32[2,1,32], index: 18, kind: input, shape index: {}]   ;;  %s2922_s19 = inlined_call_operand.vmem [shape: f32[2,1,32], index: 19, kind: input, shape index: {}]   ;;  %s2923_s20 = inlined_call_operand.vmem [shape: bf16[32,16], index: 20, kind: input, shape index: {}]   ;;  %s2924_s21 = inlined_call_operand.vmem [shape: f32[1,16], index: 21, kind: input, shape index: {}]   ;;  %s2925_s22 = inlined_call_operand.hbm [shape: f32[16,16], index: 22, kind: output, shape index: {}]  }
   0x1   :  { %2928 = sst [smem:[#allocation5_spill]] %s2903_s0 }
   0x2   :  { %2929 = sst [smem:[#allocation6_spill]] %s2904_s1 }
   0x3   :  { %2930 = sst [smem:[#allocation7_spill]] %s2905_s2 }
   0x4   :  { %2931 = sst [smem:[#allocation8_spill]] %s2906_s3 }
   0x5   :  { %2932 = sst [smem:[#allocation9_spill]] %s2907_s4 }
   0x6   :  { %2933 = sst [smem:[#allocation10_spill]] %s2908_s5 }
   0x7   :  { %2934 = sst [smem:[#allocation11_spill]] %s2909_s6 }
   0x8   :  { %s2935_s29 = sld [smem:[#allocation5_spill]]  ;;  %v2348_v1 = vmov 1   ;;  %v2349_v2 = vmov 0   ;;  %v2350_v4 = vmov 2   ;;  %s2936_s1 = sld [smem:[#allocation8_spill]]  ;;  %v2351_v8 = vmov 0.0  }
   0x9   :  { %2199 = vset.pattern.permute.xlu1 %v2348_v1  ;;  %2198 = vset.pattern.permute.xlu0 %v2349_v2  ;;  %v2352_v9 = vmov 3   ;;  %vm2353_vm0 = vmmov 0  }
   0xa   :  { %2027 = vmatprep.subr.bf16.mxu0 %v2351_v8  ;;  %2035 = vmatprep.subr.bf16.mxu1 %v2351_v8 }
   0xb   :  { %2031 = vmatprep.mubr.msk.bf16.mxu0 %vm2353_vm0, %v2351_v8  ;;  %2037 = vmatprep.mubr.msk.bf16.mxu1 %vm2353_vm0, %v2351_v8 }
   0xe   :  { %v73_v0 = vld [vmem:[%s2935_s29] sm:$0xff]  ;;  %v74_v3 = vld [vmem:[%s2935_s29 + $0x8] sm:$0xff]  ;;  %v151_v10 = vld [vmem:[%s2936_s1 + $0x10] sm:$0xff] }
   0xf   :  { %102 = vperm.xlu1 %2199, %v73_v0   ;;  %79 = vperm.xlu0 %2198, %v73_v0   ;;  %v149_v5 = vld [vmem:[%s2936_s1] sm:$0xff]  ;;  %v150_v6 = vld [vmem:[%s2936_s1 + $0x8] sm:$0xff]  ;;  %v152_v11 = vld [vmem:[%s2936_s1 + $0x18] sm:$0xff] }
  0x10   :  { %v153_v7 = vpack.c.bf16 %v150_v6, %v149_v5  ;;  %v154_v12 = vpack.c.bf16 %v152_v11, %v151_v10 }
  0x12   :  { %2028 = vmatpush3.bf16.msra.mxu0 %v153_v7 }
  0x13   :  { %106 = vperm.xlu1 %2199, %v74_v3   ;;  %84 = vperm.xlu0 %2198, %v74_v3  }
  0x14   :  { %2029 = vmatprep.subr.bf16.mxu0 %v2351_v8 }
  0x16   :  { %2030 = vmatpush3.bf16.msra.mxu0 %v154_v12 }
  0x17   :  { %2201 = vset.pattern.permute.xlu1 %v2350_v4  ;;  %2200 = vset.pattern.permute.xlu0 %v2350_v4 }
  0x18   :  { %122 = vperm.xlu1 %2201, %v74_v3   ;;  %118 = vperm.xlu0 %2200, %v73_v0  }
  0x19   :  { %2041 = vmatprep.subr.bf16.mxu0 %v2351_v8 }
  0x1c   :  { %2202 = vset.pattern.permute.xlu1 %v2352_v9  ;;  %2203 = vset.pattern.permute.xlu0 %v2352_v9 }
  0x1d   :  { %134 = vperm.xlu1 %2202, %v73_v0   ;;  %138 = vperm.xlu0 %2203, %v74_v3  }
  0x1e   :  { %27 = vsyncpa [#allocation3], 0  ;;  %v87_v13 = vlaneseq  ;;  %s2937_s28 = sld [smem:[#allocation6_spill]]  ;;  %s2938_s4 = sld [smem:[#allocation7_spill]]  ;;  %vm158_vm1 = vcmask 261120   ;;  %vm212_vm2 = vcmask 1041408  }
  0x1f   :  { %s2939_s1 = sld [smem:[#allocation9_spill]]  ;;  %vm203_vm3 = vcmask 31744   ;;  %s2940_s30 = sld [smem:[#allocation10_spill]]  ;;  %vm1805_vm8 = vcmask 130048  }
  0x20   :  { %v88_v14 = vshrl.u32 %v87_v13, 7  ;;  %s2941_s23 = sld [smem:[#allocation11_spill]]  ;;  %s2355_s24 = smov 64  }
  0x22   :  { %v89_v15 = vsub.s32 0, %v88_v14  ;;  %v111_v20 = vsub.s32 1, %v88_v14  ;;  %v127_v21 = vsub.s32 2, %v88_v14  ;;  %v143_v27 = vsub.s32 3, %v88_v14 }
  0x24   :  { %v75_v16 = vld [vmem:[%s2937_s28] sm:$0xf] }
  0x25   :  { %v90_v19 = vrot.slane %v75_v16, %v89_v15  ;;  %v1848_v26 = vld [vmem:[%s2938_s4] ss:$0 sm:$0xff]  ;;  %v112_v28 = vrot.slane %v75_v16, %v111_v20  ;;  %v128_v30 = vrot.slane %v75_v16, %v127_v21  ;;  %v144_v35 = vrot.slane %v75_v16, %v143_v27  ;;  %v2229_v20 = vld [vmem:[%s2912_s9 + $0x14] ss:$8 sps:$4 sm:$0xff]   ;;  %v2227_v21 = vld [vmem:[%s2912_s9 + $0x10] ss:$8 sps:$4 sm:$0xff]  }
  0x26   :  { %v155_v50 = vld [vmem:[%s2939_s1] sm:$0xf] }
  0x27   :  { %v156_v51 = vpack.c.bf16 %v155_v50, %v155_v50 }
  0x29   :  { %v214_v52 = vsel %vm212_vm2, %v156_v51, 0 }
  0x2a   :  { %2036 = vmatpush3.bf16.msra.mxu1 %v214_v52 }
  0x8e   :  { %v103_v17 = vpop.permute.xlu1 %102  ;;  %v80_v18 = vpop.permute.xlu0 %79 }
  0x8f   :  { %v91_v24 = vmul.f32 %v90_v19, %v80_v18  ;;  %v113_v36 = vmul.f32 %v112_v28, %v103_v17  ;;  %v2226_v18 = vld [vmem:[%s2912_s9 + $0x4] ss:$8 sps:$4 sm:$0xff]  }
  0x90   :  { %403 = vmatprep.subr.bf16.mxu1 %v2226_v18 }
  0x91   :  { %v99_v31 = vadd.f32 %v1848_v26, %v91_v24 }
  0x92   :  { %v107_v22 = vpop.permute.xlu1 %106  ;;  %v85_v23 = vpop.permute.xlu0 %84 }
  0x93   :  { %v92_v25 = vmul.f32 %v90_v19, %v85_v23  ;;  %v114_v32 = vmul.f32 %v112_v28, %v107_v22  ;;  %v115_v40 = vadd.f32 %v113_v36, %v99_v31  ;;  %v2224_v19 = vld [vmem:[%s2912_s9] ss:$8 sps:$4 sm:$0xff]  }
  0x94   :  { %v356_v28 = vld [vmem:[%s2940_s30] sm:$0xff] }
  0x95   :  { %v100_v29 = vadd.f32 %v1848_v26, %v92_v25  ;;  %v359_v31 = vld [vmem:[%s2941_s23] sm:$0xff] }
  0x96   :  { %v364_v36 = vld [vmem:[%s2910_s7] sm:$0xff]  ;;  %s2354_s7 = smov 96  }
  0x97   :  { %v123_v33 = vpop.permute.xlu1 %122  ;;  %v119_v34 = vpop.permute.xlu0 %118  ;;  %v116_v37 = vadd.f32 %v114_v32, %v100_v29 }
  0x98   :  { %v130_v38 = vmul.f32 %v128_v30, %v123_v33  ;;  %v129_v39 = vmul.f32 %v128_v30, %v119_v34 }
  0x9a   :  { %v132_v43 = vadd.f32 %v130_v38, %v116_v37  ;;  %v131_v44 = vadd.f32 %v129_v39, %v115_v40 }
  0x9c   :  { %v135_v41 = vpop.permute.xlu1 %134  ;;  %v139_v42 = vpop.permute.xlu0 %138 }
  0x9d   :  { %v145_v45 = vmul.f32 %v144_v35, %v135_v41  ;;  %v146_v46 = vmul.f32 %v144_v35, %v139_v42 }
  0x9f   :  { %v147_v47 = vadd.f32 %v145_v45, %v131_v44  ;;  %v148_v48 = vadd.f32 %v146_v46, %v132_v43 }
  0xa1   :  { %v157_v49 = vpack.c.bf16 %v148_v48, %v147_v47 }
  0xa3   :  { %2032 = vmatmul.mubr.msk.bf16.vlgmr.msra.gmra.mrb[0].mxu0 %vm158_vm1, %v157_v49 }
  0xa4   :  { %2042 = vmatpush3.bf16.msra.mxu0 %v153_v7  ;;  %2045 = vmatprep.mubr.msk.bf16.mxu0 %vm2353_vm0, %v2351_v8 }
  0xa5   :  { %2043 = vmatprep.subr.bf16.mxu0 %v2351_v8 }
  0xa8   :  { %2044 = vmatpush3.bf16.msra.mxu0 %v154_v12 }
  0xa9   :  { %2049 = vmatprep.subr.bf16.mxu0 %v2351_v8 }
 0x176   :  { %v196_v53 = vpop.f32.mrb[0].mxu0 }
 0x177   :  { %v2033_v54 = vpop.f32.mrb[1].mxu0  ;;  %v204_v56 = vsel %vm203_vm3, %v196_v53, 0.0 }
 0x178   :  { %v199_v55 = vpop.f32.mrb[2].mxu0 }
 0x179   :  { %v205_v57 = vsel %vm203_vm3, %v199_v55, 0.0  ;;  %v2034_v58 = vpop.f32.mrb[3].mxu0 }
 0x17a   :  { %v206_v59 = vadd.f32 %v205_v57, %v204_v56  ;;  %v2576_v58 = vld [vmem:[%s2911_s8] sm:$0xff] }
 0x17b   :  { %vm371_vm4 = vcmp.gt.f32.partialorder %v2576_v58, 0.5 }
 0x17c   :  { %v207_v60 = vmul.f32 0.0625, %v206_v59 }
 0x17e   :  { %v208_v61 = vpack.c.bf16 %v207_v60, %v207_v60  ;;  %v2581_v60 = vld [vmem:[%s2911_s8 + $0x8] sm:$0xff] }
 0x17f   :  { %vm372_vm5 = vcmp.gt.f32.partialorder %v2581_v60, 0.5 }
 0x180   :  { %2038 = vmatmul.mubr.msk.bf16.vlgmr.msra.gmra.mrb[0].mxu1 %vm203_vm3, %v208_v61  ;;  %v2586_v61 = vld [vmem:[%s2911_s8 + $0x18] sm:$0xff] }
 0x181   :  { %435 = vmatprep.mubr.bf16.mxu1 %v2349_v2  ;;  %404 = vmatpush1.bf16.msra.mxu1 %v2224_v19  ;;  %vm374_vm6 = vcmp.gt.f32.partialorder %v2586_v61, 0.5 }
 0x182   :  { %405 = vmatprep.subr.bf16.mxu1 %v2229_v20 }
 0x185   :  { %406 = vmatpush1.bf16.msra.mxu1 %v2227_v21 }
 0x253   :  { %v250_v62 = vpop.f32.mrb[0].mxu1 }
 0x254   :  { %v256_v63 = vsub.f32 %v147_v47, %v250_v62  ;;  %v257_v0 = vsub.f32 %v148_v48, %v250_v62  ;;  %v2039_v1 = vpop.f32.mrb[1].mxu1 }
 0x255   :  { %v253_v3 = vpop.f32.mrb[2].mxu1  ;;  %v2592_v1 = vld [vmem:[%s2911_s8 + $0x10] sm:$0xff] }
 0x256   :  { %v258_v4 = vmul.f32 %v256_v63, %v256_v63  ;;  %v259_v5 = vmul.f32 %v257_v0, %v257_v0  ;;  %v2040_v6 = vpop.f32.mrb[3].mxu1  ;;  %vm373_vm7 = vcmp.gt.f32.partialorder %v2592_v1, 0.5 }
 0x258   :  { %v260_v7 = vpack.c.bf16 %v259_v5, %v258_v4 }
 0x25a   :  { %2046 = vmatmul.mubr.msk.bf16.vlgmr.msra.gmra.mrb[4].mxu0 %vm158_vm1, %v260_v7 }
 0x25b   :  { %2050 = vmatpush3.bf16.msra.mxu0 %v214_v52  ;;  %2051 = vmatprep.mubr.msk.bf16.mxu0 %vm2353_vm0, %v2351_v8 }
 0x32d   :  { %v298_v9 = vpop.f32.mrb[4].mxu0 }
 0x32e   :  { %v2047_v10 = vpop.f32.mrb[5].mxu0  ;;  %v305_v12 = vsel %vm203_vm3, %v298_v9, 0.0 }
 0x32f   :  { %v301_v11 = vpop.f32.mrb[6].mxu0 }
 0x330   :  { %v306_v13 = vsel %vm203_vm3, %v301_v11, 0.0  ;;  %v2048_v14 = vpop.f32.mrb[7].mxu0 }
 0x331   :  { %v307_v15 = vadd.f32 %v306_v13, %v305_v12 }
 0x333   :  { %v308_v16 = vmul.f32 0.0625, %v307_v15 }
 0x335   :  { %v309_v17 = vpack.c.bf16 %v308_v16, %v308_v16 }
 0x337   :  { %2052 = vmatmul.mubr.msk.bf16.vlgmr.msra.gmra.mrb[8].mxu0 %vm203_vm3, %v309_v17 }
 0x40a   :  { %v347_v22 = vpop.f32.mrb[8].mxu0 }
 0x40b   :  { %v348_v23 = vadd.f32 1e-05, %v347_v22  ;;  %v2053_v24 = vpop.f32.mrb[9].mxu0 }
 0x40c   :  { %v350_v25 = vpop.f32.mrb[10].mxu0 }
 0x40d   :  { %2266 = vrsqrt.f32 %v348_v23  ;;  %v2054_v26 = vpop.f32.mrb[11].mxu0 }
 0x417   :  { %v2267_v27 = vpop.eup %2266 }
 0x418   :  { %v354_v29 = vmul.f32 %v2267_v27, %v256_v63  ;;  %v355_v30 = vmul.f32 %v2267_v27, %v257_v0 }
 0x41a   :  { %v357_v32 = vmul.f32 %v356_v28, %v354_v29  ;;  %v358_v33 = vmul.f32 %v356_v28, %v355_v30 }
 0x41c   :  { %v360_v34 = vadd.f32 %v359_v31, %v357_v32  ;;  %v361_v35 = vadd.f32 %v359_v31, %v358_v33 }
 0x41e   :  { %v362_v37 = vmax.f32 %v360_v34, 0.0  ;;  %v363_v38 = vmax.f32 %v361_v35, 0.0 }
 0x420   :  { %v2546_v39 = vadd.f32 %v364_v36, %v362_v37  ;;  %v2548_v40 = vadd.f32 %v364_v36, %v363_v38  ;;  %v2231_v36 = vld [vmem:[%s2913_s10 + $0x10] sm:$0xff]  }
 0x422   :  { %v375_v41 = vpack.c.bf16 %v2548_v40, %v2546_v39 }
 0x424   :  { %1857 = vmatmul.mubr.msk.bf16.vlgmr.msra.gmra.mrb[4].mxu1 %vm158_vm1, %v375_v41 }
 0x4f7   :  { %v437_v42 = vpop.f32.mrb[4].mxu1 }
 0x4f8   :  { %v2553_v43 = vpop.f32.mrb[5].mxu1 }
 0x4f9   :  { %v441_v44 = vpop.f32.mrb[6].mxu1 }
 0x4fa   :  { %v2204_v45 = vpack.i.bf16 %v441_v44, %v437_v42  ;;  %v454_v46 = vpack.c.bf16 %v441_v44, %v437_v42  ;;  %v2555_v47 = vpop.f32.mrb[7].mxu1 }
 0x4fb   :  { %v2209_v48 = vpack.i.bf16 %v2555_v47, %v2553_v43  ;;  %v464_v49 = vpack.c.bf16 %v2555_v47, %v2553_v43 }
 0x4fc   :  { %2205 = vrot.lane.b32.xlu1 %v2204_v45, %s2354_s7  ;;  %2059 = vmatprep.mubr.msk.bf16.mxu0 %vm158_vm1, %v454_v46 }
 0x4fd   :  { %2063 = vmatprep.subr.bf16.mxu1 %v464_v49 }
 0x4fe   :  { %2064 = vmatpush3.bf16.msra.mxu1 %v464_v49 }
 0x500   :  { %468 = vrot.lane.b32.xlu1 %v454_v46, %s2355_s24 }
 0x56e   :  { %v2206_v50 = vpop.permute.xlu1 %2205 }
 0x56f   :  { %v2208_v51 = vunpack.i.h.bf16 %v2206_v50  ;;  %v2207_v52 = vunpack.i.l.bf16 %v2206_v50 }
 0x571   :  { %v455_v53 = vpack.c.bf16 %v2208_v51, %v2207_v52 }
 0x572   :  { %v469_v54 = vpop.permute.xlu1 %468 }
 0x573   :  { %v479_v55 = vsel %vm158_vm1, %v469_v54, 0  ;;  %470 = vrot.lane.b32.xlu0 %v455_v53, %s2355_s24  ;;  %2183 = vmatprep.subr.msk.bf16.mxu0 %vm158_vm1, %v469_v54 }
 0x574   :  { %2056 = vmatpush3.bf16.xpose.msra.mxu0 %v479_v55 }
 0x5e5   :  { %v471_v56 = vpop.permute.xlu0 %470 }
 0x5e6   :  { %v482_v57 = vsel %vm158_vm1, %v471_v56, 0  ;;  %2184 = vmatprep.subr.msk.bf16.mxu0 %vm158_vm1, %v471_v56  ;;  %v2230_v56 = vld [vmem:[%s2913_s10] sm:$0xff]  }
 0x5e7   :  { %2058 = vmatpush3.bf16.xpose.msra.mxu0 %v482_v57 }
 0x5e8   :  { %2079 = vmatprep.subr.bf16.mxu0 %v2351_v8 }
 0x5ee   :  { %2060 = vmatmul.mubr.msk.bf16.vlgmr.msra.gmra.mrb[12].mxu0 %vm158_vm1, %v455_v53 }
 0x5ef   :  { %2083 = vmatprep.mubr.msk.bf16.mxu0 %vm2353_vm0, %v2351_v8  ;;  %2080 = vmatpush3.bf16.msra.mxu0 %v2231_v36  ;;  %v2237_v36 = vld [vmem:[%s2919_s16 + $0x8] sm:$0xff]  }
 0x5f0   :  { %2081 = vmatprep.subr.bf16.mxu0 %v2351_v8 }
 0x6c1   :  { %v2061_v59 = vpop.f32.mrb[12].mxu0 }
 0x6c2   :  { %v518_v62 = vpop.f32.mrb[13].mxu0  ;;  %v535_v5 = vmul.f32 0.17677669, %v2061_v59  ;;  %v2233_v59 = vld [vmem:[%s2913_s10 + $0x18] sm:$0xff]  }
 0x6c3   :  { %v533_v63 = vmul.f32 0.17677669, %v518_v62  ;;  %v2062_v0 = vpop.f32.mrb[14].mxu0  ;;  %v2232_v62 = vld [vmem:[%s2913_s10 + $0x8] sm:$0xff]   ;;  %2082 = vmatpush3.bf16.msra.mxu0 %v2233_v59 }
 0x6c4   :  { %v536_v3 = vmul.f32 0.17677669, %v2062_v0  ;;  %v521_v4 = vpop.f32.mrb[15].mxu0  ;;  %v539_v13 = vsel %vm373_vm7, %v535_v5, -1e+30  ;;  %2095 = vmatprep.subr.bf16.mxu0 %v2351_v8 }
 0x6c5   :  { %v534_v6 = vmul.f32 0.17677669, %v521_v4  ;;  %v537_v7 = vsel %vm371_vm4, %v533_v63, -1e+30  ;;  %v547_v15 = vsel %vm158_vm1, %v539_v13, -inf }
 0x6c6   :  { %v541_v9 = vsel %vm158_vm1, %v537_v7, -inf  ;;  %v540_v11 = vsel %vm374_vm6, %v536_v3, -1e+30 }
 0x6c7   :  { %542 = vmax.xlane.f32.xlu1 %v541_v9  ;;  %v538_v10 = vsel %vm372_vm5, %v534_v6, -1e+30  ;;  %v550_v14 = vsel %vm158_vm1, %v540_v11, -inf }
 0x6c8   :  { %v544_v12 = vsel %vm158_vm1, %v538_v10, -inf }
 0x6c9   :  { %545 = vmax.xlane.f32.xlu0 %v544_v12 }
 0x6cb   :  { %551 = vmax.xlane.f32.xlu1 %v550_v14 }
 0x6cd   :  { %548 = vmax.xlane.f32.xlu0 %v547_v15 }
 0x754   :  { %v543_v16 = vpop.xlane.xlu1 %542 }
 0x755   :  { %v553_v20 = vsub.f32 %v537_v7, %v543_v16  ;;  %v1865_v7 = vld [vmem:[%s2914_s11] ss:$0 sm:$0xff] }
 0x756   :  { %v546_v17 = vpop.xlane.xlu0 %545 }
 0x757   :  { %v554_v18 = vsub.f32 %v538_v10, %v546_v17  ;;  %v557_v26 = vmul.f32 1.442695, %v553_v20 }
 0x758   :  { %v552_v19 = vpop.xlane.xlu1 %551 }
 0x759   :  { %v559_v21 = vmul.f32 1.442695, %v554_v18  ;;  %v556_v22 = vsub.f32 %v540_v11, %v552_v19 }
 0x75a   :  { %v549_v23 = vpop.xlane.xlu0 %548 }
 0x75b   :  { %2268 = vpow2.f32 %v559_v21  ;;  %v563_v24 = vmul.f32 1.442695, %v556_v22  ;;  %v555_v25 = vsub.f32 %v539_v13, %v549_v23 }
 0x75d   :  { %2270 = vpow2.f32 %v563_v24  ;;  %v561_v27 = vmul.f32 1.442695, %v555_v25 }
 0x75f   :  { %2272 = vpow2.f32 %v561_v27 }
 0x760   :  { %2274 = vpow2.f32 %v557_v26 }
 0x765   :  { %v2269_v28 = vpop.eup %2268 }
 0x766   :  { %v568_v29 = vsel %vm158_vm1, %v2269_v28, 0.0 }
 0x767   :  { %v2271_v30 = vpop.eup %2270  ;;  %569 = vadd.xlane.f32.xlu1 %v568_v29 }
 0x768   :  { %v574_v32 = vsel %vm158_vm1, %v2271_v30, 0.0 }
 0x769   :  { %v2273_v31 = vpop.eup %2272 }
 0x76a   :  { %v571_v33 = vsel %vm158_vm1, %v2273_v31, 0.0  ;;  %v2275_v34 = vpop.eup %2274 }
 0x76b   :  { %575 = vadd.xlane.f32.xlu1 %v574_v32  ;;  %572 = vadd.xlane.f32.xlu0 %v571_v33  ;;  %v565_v35 = vsel %vm158_vm1, %v2275_v34, 0.0 }
 0x76f   :  { %566 = vadd.xlane.f32.xlu0 %v565_v35  ;;  %v2236_v35 = vld [vmem:[%s2919_s16] sm:$0xff]  }
 0x785   :  { %2210 = vrot.lane.b32.xlu0 %v2209_v48, %s2354_s7 }
 0x7f4   :  { %v570_v37 = vpop.xlane.xlu1 %569 }
 0x7f8   :  { %v576_v38 = vpop.xlane.xlu1 %575  ;;  %v573_v41 = vpop.xlane.xlu0 %572 }
 0x7f9   :  { %2276 = vrcp.f32 %v576_v38  ;;  %v2239_v38 = vld [vmem:[%s2919_s16 + $0x18] sm:$0xff]  }
 0x7fa   :  { %2278 = vrcp.f32 %v573_v41  ;;  %v2240_v41 = vld [vmem:[%s2919_s16 + $0x20] sm:$0xff]  }
 0x7fb   :  { %2280 = vrcp.f32 %v570_v37  ;;  %v2238_v37 = vld [vmem:[%s2919_s16 + $0x10] sm:$0xff]  }
 0x7fc   :  { %v567_v42 = vpop.xlane.xlu0 %566 }
 0x7fd   :  { %2282 = vrcp.f32 %v567_v42  ;;  %v2241_v42 = vld [vmem:[%s2919_s16 + $0x28] sm:$0xff]  }
 0x800   :  { %v2211_v44 = vpop.permute.xlu0 %2210 }
 0x801   :  { %v2213_v45 = vunpack.i.h.bf16 %v2211_v44  ;;  %v2212_v46 = vunpack.i.l.bf16 %v2211_v44 }
 0x803   :  { %v2277_v43 = vpop.eup %2276  ;;  %v465_v47 = vpack.c.bf16 %v2213_v45, %v2212_v46 }
 0x804   :  { %v2279_v48 = vpop.eup %2278  ;;  %v584_v51 = vmul.f32 %v2277_v43, %v2271_v30 }
 0x805   :  { %v2281_v49 = vpop.eup %2280  ;;  %2065 = vmatprep.subr.bf16.mxu1 %v465_v47  ;;  %v582_v52 = vmul.f32 %v2279_v48, %v2273_v31 }
 0x806   :  { %2066 = vmatpush3.bf16.msra.mxu1 %v465_v47  ;;  %v580_v54 = vmul.f32 %v2281_v49, %v2269_v28 }
 0x807   :  { %v2283_v50 = vpop.eup %2282  ;;  %2071 = vmatprep.subr.bf16.mxu1 %v2351_v8  ;;  %v586_v57 = vpack.c.bf16 %v584_v51, %v582_v52  ;;  %v1869_v51 = vld [vmem:[%s2915_s12] ss:$0 sm:$0xff] }
 0x808   :  { %v578_v53 = vmul.f32 %v2283_v50, %v2275_v34  ;;  %v2235_v34 = vld [vmem:[%s2917_s14 + $0x8] sm:$0xff]  }
 0x80a   :  { %v585_v55 = vpack.c.bf16 %v580_v54, %v578_v53 }
 0x80c   :  { %2067 = vmatprep.mubr.msk.bf16.mxu1 %vm158_vm1, %v585_v55  ;;  %v1870_v55 = vld [vmem:[%s2916_s13] ss:$0 sm:$0xff] }
 0x80d   :  { %2068 = vmatmul.mubr.msk.bf16.vlgmr.msra.gmra.mrb[8].mxu1 %vm158_vm1, %v586_v57 }
 0x80e   :  { %2072 = vmatpush3.bf16.msra.mxu1 %v2230_v56  ;;  %2075 = vmatprep.mubr.msk.bf16.mxu1 %vm2353_vm0, %v2351_v8 }
 0x80f   :  { %2073 = vmatprep.subr.bf16.mxu1 %v2351_v8 }
 0x812   :  { %2074 = vmatpush3.bf16.msra.mxu1 %v2232_v62 }
 0x813   :  { %2087 = vmatprep.subr.bf16.mxu1 %v2351_v8 }
 0x8e0   :  { %v2069_v63 = vpop.f32.mrb[8].mxu1 }
 0x8e1   :  { %v627_v0 = vpop.f32.mrb[9].mxu1 }
 0x8e2   :  { %v2070_v3 = vpop.f32.mrb[10].mxu1 }
 0x8e3   :  { %v716_v4 = vpack.c.bf16 %v2070_v3, %v2069_v63  ;;  %v630_v5 = vpop.f32.mrb[11].mxu1  ;;  %v2242_v63 = vld [vmem:[%s2919_s16 + $0x30] sm:$0xff]   ;;  %v1871_v3 = vld [vmem:[%s2918_s15] ss:$0 sm:$0xff] }
 0x8e4   :  { %v651_v6 = vpack.c.bf16 %v630_v5, %v627_v0  ;;  %v2243_v0 = vld [vmem:[%s2919_s16 + $0x38] sm:$0xff]  }
 0x8e5   :  { %2084 = vmatmul.mubr.msk.bf16.vlgmr.msra.gmra.mrb[16].mxu0 %vm158_vm1, %v716_v4 }
 0x8e6   :  { %2076 = vmatmul.mubr.msk.bf16.vlgmr.msra.gmra.mrb[12].mxu1 %vm158_vm1, %v651_v6  ;;  %2111 = vmatprep.mubr.msk.bf16.mxu0 %vm2353_vm0, %v2351_v8 }
 0x8e7   :  { %2091 = vmatprep.mubr.msk.bf16.mxu1 %vm2353_vm0, %v2351_v8  ;;  %2096 = vmatpush3.bf16.msra.mxu0 %v2236_v35  ;;  %v2249_v35 = vld [vmem:[%s2912_s9 + $0x34] ss:$8 sps:$4 sm:$0xff]  }
 0x8e8   :  { %2097 = vmatprep.subr.bf16.mxu0 %v2351_v8 }
 0x8eb   :  { %2098 = vmatpush3.bf16.msra.mxu0 %v2237_v36 }
 0x8ec   :  { %2099 = vmatprep.subr.bf16.mxu0 %v2351_v8 }
 0x8ef   :  { %2100 = vmatpush3.bf16.msra.mxu0 %v2238_v37 }
 0x8f0   :  { %2101 = vmatprep.subr.bf16.mxu0 %v2351_v8 }
 0x8f3   :  { %2102 = vmatpush3.bf16.msra.mxu0 %v2239_v38 }
 0x8f4   :  { %2103 = vmatprep.subr.bf16.mxu0 %v2351_v8 }
 0x8f7   :  { %2104 = vmatpush3.bf16.msra.mxu0 %v2240_v41 }
 0x8f8   :  { %2105 = vmatprep.subr.bf16.mxu0 %v2351_v8 }
 0x8fb   :  { %2106 = vmatpush3.bf16.msra.mxu0 %v2241_v42 }
 0x8fc   :  { %2107 = vmatprep.subr.bf16.mxu0 %v2351_v8 }
 0x8ff   :  { %2108 = vmatpush3.bf16.msra.mxu0 %v2242_v63 }
 0x900   :  { %2109 = vmatprep.subr.bf16.mxu0 %v2351_v8 }
 0x903   :  { %2110 = vmatpush3.bf16.msra.mxu0 %v2243_v0 }
 0x904   :  { %2131 = vmatprep.subr.bf16.mxu0 %v2351_v8 }
 0x9b8   :  { %v766_v9 = vpop.f32.mrb[16].mxu0 }
 0x9b9   :  { %v701_v10 = vpop.f32.mrb[12].mxu1  ;;  %v2085_v11 = vpop.f32.mrb[17].mxu0 }
 0x9ba   :  { %v714_v12 = vadd.f32 %v1865_v7, %v701_v10  ;;  %v2077_v13 = vpop.f32.mrb[13].mxu1  ;;  %v769_v14 = vpop.f32.mrb[18].mxu0 }
 0x9bb   :  { %v704_v15 = vpop.f32.mrb[14].mxu1  ;;  %v2086_v16 = vpop.f32.mrb[19].mxu0  ;;  %v1875_v13 = vld [vmem:[%s2920_s17] ss:$0 sm:$0xff] }
 0x9bc   :  { %v773_v17 = vadd.f32 %v766_v9, %v714_v12  ;;  %v715_v18 = vadd.f32 %v1865_v7, %v704_v15  ;;  %v2078_v19 = vpop.f32.mrb[15].mxu1 }
 0x9be   :  { %v774_v20 = vadd.f32 %v769_v14, %v715_v18  ;;  %v775_v21 = vadd.f32 %v773_v17, %v2546_v39 }
 0x9c0   :  { %v779_v22 = vsel %vm158_vm1, %v775_v21, 0.0  ;;  %v776_v23 = vadd.f32 %v774_v20, %v2548_v40  ;;  %v2234_v40 = vld [vmem:[%s2917_s14] sm:$0xff]  }
 0x9c1   :  { %780 = vadd.xlane.f32.xlu1 %v779_v22  ;;  %2088 = vmatpush3.bf16.msra.mxu1 %v2234_v40  ;;  %v2244_v40 = vld [vmem:[%s2912_s9 + $0x20] ss:$8 sps:$4 sm:$0xff]  }
 0x9c2   :  { %v782_v24 = vsel %vm158_vm1, %v776_v23, 0.0  ;;  %2089 = vmatprep.subr.bf16.mxu1 %v2351_v8 }
 0x9c5   :  { %783 = vadd.xlane.f32.xlu1 %v782_v24  ;;  %2090 = vmatpush3.bf16.msra.mxu1 %v2235_v34  ;;  %v2247_v34 = vld [vmem:[%s2912_s9 + $0x30] ss:$8 sps:$4 sm:$0xff]  }
 0xa4e   :  { %v781_v25 = vpop.xlane.xlu1 %780 }
 0xa4f   :  { %v786_v26 = vmul.f32 0.03125, %v781_v25 }
 0xa51   :  { %v788_v27 = vsub.f32 %v775_v21, %v786_v26 }
 0xa52   :  { %v784_v28 = vpop.xlane.xlu1 %783 }
 0xa53   :  { %v787_v29 = vmul.f32 0.03125, %v784_v28  ;;  %v790_v30 = vmul.f32 %v788_v27, %v788_v27 }
 0xa55   :  { %v789_v31 = vsub.f32 %v776_v23, %v787_v29  ;;  %v792_v32 = vsel %vm158_vm1, %v790_v30, 0.0 }
 0xa56   :  { %793 = vadd.xlane.f32.xlu1 %v792_v32 }
 0xa57   :  { %v791_v33 = vmul.f32 %v789_v31, %v789_v31 }
 0xa59   :  { %v795_v39 = vsel %vm158_vm1, %v791_v33, 0.0 }
 0xa5a   :  { %796 = vadd.xlane.f32.xlu1 %v795_v39  ;;  %v2246_v39 = vld [vmem:[%s2912_s9 + $0x24] ss:$8 sps:$4 sm:$0xff]  }
 0xa5b   :  { %1080 = vmatprep.subr.bf16.mxu1 %v2246_v39 }
 0xae3   :  { %v794_v44 = vpop.xlane.xlu1 %793 }
 0xae4   :  { %v798_v45 = vmul.f32 0.03125, %v794_v44 }
 0xae6   :  { %v800_v46 = vadd.f32 1e-05, %v798_v45 }
 0xae7   :  { %v797_v43 = vpop.xlane.xlu1 %796 }
 0xae8   :  { %2284 = vrsqrt.f32 %v800_v46  ;;  %v799_v47 = vmul.f32 0.03125, %v797_v43  ;;  %v1884_v43 = vld [vmem:[%s2921_s18] ss:$0 sm:$0xff] }
 0xaea   :  { %v801_v48 = vadd.f32 1e-05, %v799_v47 }
 0xaec   :  { %2286 = vrsqrt.f32 %v801_v48 }
 0xaf2   :  { %v2285_v49 = vpop.eup %2284 }
 0xaf3   :  { %v804_v50 = vmul.f32 %v2285_v49, %v788_v27 }
 0xaf5   :  { %v812_v53 = vmul.f32 %v1869_v51, %v804_v50  ;;  %v1885_v50 = vld [vmem:[%s2922_s19] ss:$0 sm:$0xff] }
 0xaf6   :  { %v2287_v52 = vpop.eup %2286 }
 0xaf7   :  { %v805_v54 = vmul.f32 %v2287_v52, %v789_v31  ;;  %v820_v57 = vadd.f32 %v1870_v55, %v812_v53 }
 0xaf9   :  { %v813_v56 = vmul.f32 %v1869_v51, %v805_v54 }
 0xafb   :  { %v821_v59 = vadd.f32 %v1870_v55, %v813_v56 }
 0xafd   :  { %v822_v62 = vpack.c.bf16 %v821_v59, %v820_v57 }
 0xaff   :  { %2092 = vmatmul.mubr.msk.bf16.vlgmr.msra.gmra.mrb[16].mxu1 %vm158_vm1, %v822_v62 }
 0xb00   :  { %1112 = vmatprep.mubr.bf16.mxu1 %v2349_v2  ;;  %1081 = vmatpush1.bf16.msra.mxu1 %v2244_v40 }
 0xb01   :  { %1082 = vmatprep.subr.bf16.mxu1 %v2249_v35 }
 0xb04   :  { %1083 = vmatpush1.bf16.msra.mxu1 %v2247_v34 }
 0xbd2   :  { %v883_v4 = vpop.f32.mrb[16].mxu1 }
 0xbd3   :  { %v884_v2 = vadd.f32 %v1871_v3, %v883_v4  ;;  %v2093_v5 = vpop.f32.mrb[17].mxu1 }
 0xbd4   :  { %v886_v6 = vpop.f32.mrb[18].mxu1 }
 0xbd5   :  { %v887_v7 = vadd.f32 %v1871_v3, %v886_v6  ;;  %v2094_v9 = vpop.f32.mrb[19].mxu1  ;;  %v890_v10 = vmax.f32 %v884_v2, 0.0 }
 0xbd7   :  { %v891_v11 = vmax.f32 %v887_v7, 0.0 }
 0xbd9   :  { %v892_v12 = vpack.c.bf16 %v891_v11, %v890_v10 }
 0xbdb   :  { %2112 = vmatmul.mubr.bf16.vlgmr.msra.gmra.mrb[20].mxu0 %v892_v12 }
 0xbdc   :  { %2135 = vmatprep.mubr.msk.bf16.mxu0 %vm2353_vm0, %v2351_v8 }
 0xcae   :  { %v998_v14 = vpop.f32.mrb[20].mxu0 }
 0xcaf   :  { %v999_v15 = vadd.f32 %v1875_v13, %v998_v14  ;;  %v2113_v16 = vpop.f32.mrb[21].mxu0 }
 0xcb0   :  { %v1001_v17 = vpop.f32.mrb[22].mxu0 }
 0xcb1   :  { %v1002_v18 = vadd.f32 %v1875_v13, %v1001_v17  ;;  %v2114_v19 = vpop.f32.mrb[23].mxu0  ;;  %v1005_v20 = vadd.f32 %v999_v15, %v820_v57 }
 0xcb3   :  { %v1009_v21 = vsel %vm158_vm1, %v1005_v20, 0.0  ;;  %v1006_v22 = vadd.f32 %v1002_v18, %v821_v59 }
 0xcb4   :  { %1010 = vadd.xlane.f32.xlu1 %v1009_v21 }
 0xcb5   :  { %v1012_v23 = vsel %vm158_vm1, %v1006_v22, 0.0 }
 0xcb8   :  { %1013 = vadd.xlane.f32.xlu1 %v1012_v23 }
 0xd41   :  { %v1011_v24 = vpop.xlane.xlu1 %1010 }
 0xd42   :  { %v1015_v25 = vmul.f32 0.03125, %v1011_v24 }
 0xd44   :  { %v1017_v26 = vsub.f32 %v1005_v20, %v1015_v25 }
 0xd45   :  { %v1014_v27 = vpop.xlane.xlu1 %1013 }
 0xd46   :  { %v1016_v28 = vmul.f32 0.03125, %v1014_v27  ;;  %v1019_v29 = vmul.f32 %v1017_v26, %v1017_v26 }
 0xd48   :  { %v1018_v30 = vsub.f32 %v1006_v22, %v1016_v28  ;;  %v1021_v31 = vsel %vm158_vm1, %v1019_v29, 0.0 }
 0xd49   :  { %1022 = vadd.xlane.f32.xlu0 %v1021_v31 }
 0xd4a   :  { %v1020_v32 = vmul.f32 %v1018_v30, %v1018_v30 }
 0xd4c   :  { %v1024_v33 = vsel %vm158_vm1, %v1020_v32, 0.0 }
 0xd4d   :  { %1025 = vadd.xlane.f32.xlu1 %v1024_v33 }
 0xdd6   :  { %v1023_v36 = vpop.xlane.xlu0 %1022 }
 0xdd7   :  { %v1027_v37 = vmul.f32 0.03125, %v1023_v36 }
 0xdd9   :  { %v1029_v38 = vadd.f32 1e-05, %v1027_v37 }
 0xdda   :  { %v1026_v41 = vpop.xlane.xlu1 %1025 }
 0xddb   :  { %2288 = vrsqrt.f32 %v1029_v38  ;;  %v1028_v42 = vmul.f32 0.03125, %v1026_v41 }
 0xddd   :  { %v1030_v44 = vadd.f32 1e-05, %v1028_v42 }
 0xddf   :  { %2290 = vrsqrt.f32 %v1030_v44 }
 0xde5   :  { %v2289_v45 = vpop.eup %2288 }
 0xde6   :  { %v1033_v46 = vmul.f32 %v2289_v45, %v1017_v26  ;;  %v2250_v45 = vld [vmem:[%s2913_s10 + $0x20] sm:$0xff]  }
 0xde7   :  { %2132 = vmatpush3.bf16.msra.mxu0 %v2250_v45 }
 0xde8   :  { %v1041_v48 = vmul.f32 %v1884_v43, %v1033_v46  ;;  %2133 = vmatprep.subr.bf16.mxu0 %v2351_v8 }
 0xde9   :  { %v2291_v47 = vpop.eup %2290 }
 0xdea   :  { %v1034_v49 = vmul.f32 %v2291_v47, %v1018_v30  ;;  %v2730_v52 = vadd.f32 %v1885_v50, %v1041_v48 }
 0xdec   :  { %v1042_v51 = vmul.f32 %v1884_v43, %v1034_v49 }
 0xdee   :  { %v2732_v53 = vadd.f32 %v1885_v50, %v1042_v51 }
 0xdf0   :  { %v1051_v54 = vpack.c.bf16 %v2732_v53, %v2730_v52 }
 0xdf2   :  { %1894 = vmatmul.mubr.msk.bf16.vlgmr.msra.gmra.mrb[20].mxu1 %vm158_vm1, %v1051_v54 }
 0xec5   :  { %v1114_v55 = vpop.f32.mrb[20].mxu1 }
 0xec6   :  { %v2737_v56 = vpop.f32.mrb[21].mxu1 }
 0xec7   :  { %v1118_v57 = vpop.f32.mrb[22].mxu1 }
 0xec8   :  { %v2214_v59 = vpack.i.bf16 %v1118_v57, %v1114_v55  ;;  %v1131_v62 = vpack.c.bf16 %v1118_v57, %v1114_v55  ;;  %v2739_v63 = vpop.f32.mrb[23].mxu1 }
 0xec9   :  { %v2219_v0 = vpack.i.bf16 %v2739_v63, %v2737_v56  ;;  %v1141_v3 = vpack.c.bf16 %v2739_v63, %v2737_v56 }
 0xeca   :  { %2215 = vrot.lane.b32.xlu1 %v2214_v59, %s2354_s7  ;;  %2119 = vmatprep.mubr.msk.bf16.mxu1 %vm158_vm1, %v1131_v62 }
 0xece   :  { %1145 = vrot.lane.b32.xlu1 %v1131_v62, %s2355_s24 }
 0xf3c   :  { %v2216_v4 = vpop.permute.xlu1 %2215 }
 0xf3d   :  { %v2218_v2 = vunpack.i.h.bf16 %v2216_v4  ;;  %v2217_v5 = vunpack.i.l.bf16 %v2216_v4 }
 0xf3f   :  { %v1132_v6 = vpack.c.bf16 %v2218_v2, %v2217_v5  ;;  %v2251_v2 = vld [vmem:[%s2913_s10 + $0x30] sm:$0xff]  }
 0xf40   :  { %v1146_v7 = vpop.permute.xlu1 %1145 }
 0xf41   :  { %v1156_v9 = vsel %vm158_vm1, %v1146_v7, 0  ;;  %1147 = vrot.lane.b32.xlu1 %v1132_v6, %s2355_s24  ;;  %2185 = vmatprep.subr.msk.bf16.mxu1 %vm158_vm1, %v1146_v7  ;;  %v2252_v7 = vld [vmem:[%s2913_s10 + $0x28] sm:$0xff]  }
 0xf42   :  { %2116 = vmatpush3.bf16.xpose.msra.mxu1 %v1156_v9  ;;  %2134 = vmatpush3.bf16.msra.mxu0 %v2252_v7 }
 0xf43   :  { %2147 = vmatprep.subr.bf16.mxu0 %v2351_v8 }
 0xfb3   :  { %v1148_v10 = vpop.permute.xlu1 %1147 }
 0xfb4   :  { %v1159_v11 = vsel %vm158_vm1, %v1148_v10, 0  ;;  %2186 = vmatprep.subr.msk.bf16.mxu1 %vm158_vm1, %v1148_v10 }
 0xfb5   :  { %2118 = vmatpush3.bf16.xpose.msra.mxu1 %v1159_v11 }
 0xfb6   :  { %2123 = vmatprep.subr.bf16.mxu1 %v1141_v3 }
 0xfbc   :  { %2120 = vmatmul.mubr.msk.bf16.vlgmr.msra.gmra.mrb[24].mxu1 %vm158_vm1, %v1132_v6  ;;  %v2253_v6 = vld [vmem:[%s2913_s10 + $0x38] sm:$0xff]  }
 0xfbd   :  { %2124 = vmatpush3.bf16.msra.mxu1 %v1141_v3 }
0x108f   :  { %v2121_v12 = vpop.f32.mrb[24].mxu1 }
0x1090   :  { %v1195_v13 = vpop.f32.mrb[25].mxu1  ;;  %v1212_v14 = vmul.f32 0.17677669, %v2121_v12 }
0x1091   :  { %v1210_v15 = vmul.f32 0.17677669, %v1195_v13  ;;  %v2122_v16 = vpop.f32.mrb[26].mxu1 }
0x1092   :  { %v1198_v17 = vpop.f32.mrb[27].mxu1  ;;  %v1213_v21 = vmul.f32 0.17677669, %v2122_v16  ;;  %v1216_v23 = vsel %vm373_vm7, %v1212_v14, -1e+30 }
0x1093   :  { %v1211_v18 = vmul.f32 0.17677669, %v1198_v17  ;;  %v1214_v19 = vsel %vm371_vm4, %v1210_v15, -1e+30  ;;  %v1224_v25 = vsel %vm158_vm1, %v1216_v23, -inf }
0x1094   :  { %v1218_v20 = vsel %vm158_vm1, %v1214_v19, -inf  ;;  %v1217_v58 = vsel %vm374_vm6, %v1213_v21, -1e+30  ;;  %v1911_v15 = vld [vmem:[%s2914_s11 + $0x1] ss:$0 sm:$0xff] }
0x1095   :  { %1219 = vmax.xlane.f32.xlu0 %v1218_v20  ;;  %v1215_v22 = vsel %vm372_vm5, %v1211_v18, -1e+30  ;;  %v1227_v26 = vsel %vm158_vm1, %v1217_v58, -inf }
0x1096   :  { %v1221_v24 = vsel %vm158_vm1, %v1215_v22, -inf }
0x1097   :  { %1222 = vmax.xlane.f32.xlu1 %v1221_v24 }
0x1099   :  { %1225 = vmax.xlane.f32.xlu0 %v1224_v25 }
0x109d   :  { %1228 = vmax.xlane.f32.xlu0 %v1227_v26 }
0x1122   :  { %v1220_v27 = vpop.xlane.xlu0 %1219 }
0x1123   :  { %v1230_v28 = vsub.f32 %v1214_v19, %v1220_v27 }
0x1124   :  { %v1223_v1 = vpop.xlane.xlu1 %1222 }
0x1125   :  { %v1234_v30 = vmul.f32 1.442695, %v1230_v28  ;;  %v1231_v39 = vsub.f32 %v1215_v22, %v1223_v1 }
0x1126   :  { %v1226_v29 = vpop.xlane.xlu0 %1225 }
0x1127   :  { %v1232_v60 = vsub.f32 %v1216_v23, %v1226_v29  ;;  %v1236_v34 = vmul.f32 1.442695, %v1231_v39 }
0x1129   :  { %v1238_v31 = vmul.f32 1.442695, %v1232_v60 }
0x112a   :  { %v1229_v32 = vpop.xlane.xlu0 %1228 }
0x112b   :  { %2292 = vpow2.f32 %v1238_v31  ;;  %v1233_v33 = vsub.f32 %v1217_v58, %v1229_v32 }
0x112c   :  { %2294 = vpow2.f32 %v1234_v30 }
0x112d   :  { %v1240_v40 = vmul.f32 1.442695, %v1233_v33 }
0x112f   :  { %2296 = vpow2.f32 %v1240_v40 }
0x1130   :  { %2298 = vpow2.f32 %v1236_v34 }
0x1135   :  { %v2293_v61 = vpop.eup %2292 }
0x1136   :  { %v1248_v35 = vsel %vm158_vm1, %v2293_v61, 0.0  ;;  %v2295_v36 = vpop.eup %2294 }
0x1137   :  { %1249 = vadd.xlane.f32.xlu0 %v1248_v35  ;;  %v1242_v37 = vsel %vm158_vm1, %v2295_v36, 0.0  ;;  %v2255_v35 = vld [vmem:[%s2917_s14 + $0x18] sm:$0xff]  }
0x1139   :  { %v2297_v38 = vpop.eup %2296 }
0x113a   :  { %v1251_v41 = vsel %vm158_vm1, %v2297_v38, 0.0  ;;  %v2299_v42 = vpop.eup %2298 }
0x113b   :  { %1243 = vadd.xlane.f32.xlu0 %v1242_v37  ;;  %v1245_v44 = vsel %vm158_vm1, %v2299_v42, 0.0  ;;  %v2257_v37 = vld [vmem:[%s2919_s16 + $0x48] sm:$0xff]  }
0x113f   :  { %1252 = vadd.xlane.f32.xlu0 %v1251_v41  ;;  %v2259_v41 = vld [vmem:[%s2919_s16 + $0x58] sm:$0xff]  }
0x1143   :  { %1246 = vadd.xlane.f32.xlu0 %v1245_v44  ;;  %v2261_v44 = vld [vmem:[%s2919_s16 + $0x68] sm:$0xff]  }
0x1159   :  { %2220 = vrot.lane.b32.xlu0 %v2219_v0, %s2354_s7 }
0x11c4   :  { %v1250_v46 = vpop.xlane.xlu0 %1249 }
0x11c8   :  { %v1244_v43 = vpop.xlane.xlu0 %1243 }
0x11cc   :  { %v1253_v47 = vpop.xlane.xlu0 %1252 }
0x11cd   :  { %2300 = vrcp.f32 %v1253_v47 }
0x11ce   :  { %2302 = vrcp.f32 %v1244_v43 }
0x11cf   :  { %2304 = vrcp.f32 %v1250_v46 }
0x11d0   :  { %v1247_v48 = vpop.xlane.xlu0 %1246 }
0x11d1   :  { %2306 = vrcp.f32 %v1247_v48 }
0x11d4   :  { %v2221_v49 = vpop.permute.xlu0 %2220 }
0x11d5   :  { %v2223_v50 = vunpack.i.h.bf16 %v2221_v49  ;;  %v2222_v51 = vunpack.i.l.bf16 %v2221_v49 }
0x11d7   :  { %v1142_v54 = vpack.c.bf16 %v2223_v50, %v2222_v51  ;;  %v2301_v55 = vpop.eup %2300 }
0x11d8   :  { %v2303_v56 = vpop.eup %2302  ;;  %v1261_v62 = vmul.f32 %v2301_v55, %v2297_v38  ;;  %v2258_v38 = vld [vmem:[%s2919_s16 + $0x50] sm:$0xff]  }
0x11d9   :  { %2125 = vmatprep.subr.bf16.mxu1 %v1142_v54  ;;  %v2305_v57 = vpop.eup %2304  ;;  %v1255_v63 = vmul.f32 %v2303_v56, %v2295_v36  ;;  %v2256_v36 = vld [vmem:[%s2919_s16 + $0x40] sm:$0xff]  }
0x11da   :  { %2126 = vmatpush3.bf16.msra.mxu1 %v1142_v54  ;;  %v1259_v3 = vmul.f32 %v2305_v57, %v2293_v61  ;;  %v1917_v54 = vld [vmem:[%s2915_s12 + $0x1] ss:$0 sm:$0xff] }
0x11db   :  { %v2307_v59 = vpop.eup %2306  ;;  %2139 = vmatprep.subr.bf16.mxu1 %v2351_v8 }
0x11dc   :  { %v1257_v0 = vmul.f32 %v2307_v59, %v2299_v42  ;;  %v1263_v5 = vpack.c.bf16 %v1261_v62, %v1259_v3  ;;  %v2260_v42 = vld [vmem:[%s2919_s16 + $0x60] sm:$0xff]  }
0x11dd   :  { %v1918_v59 = vld [vmem:[%s2916_s13 + $0x1] ss:$0 sm:$0xff] }
0x11de   :  { %v1262_v4 = vpack.c.bf16 %v1257_v0, %v1255_v63 }
0x11e0   :  { %2127 = vmatprep.mubr.msk.bf16.mxu1 %vm158_vm1, %v1262_v4  ;;  %v2262_v4 = vld [vmem:[%s2919_s16 + $0x70] sm:$0xff]  }
0x11e1   :  { %2128 = vmatmul.mubr.msk.bf16.vlgmr.msra.gmra.mrb[28].mxu1 %vm158_vm1, %v1263_v5  ;;  %v1924_v5 = vld [vmem:[%s2918_s15 + $0x1] ss:$0 sm:$0xff] }
0x11e2   :  { %2140 = vmatpush3.bf16.msra.mxu1 %v2251_v2  ;;  %2143 = vmatprep.mubr.msk.bf16.mxu1 %vm2353_vm0, %v2351_v8  ;;  %v2263_v2 = vld [vmem:[%s2919_s16 + $0x78] sm:$0xff]  }
0x11e3   :  { %2141 = vmatprep.subr.bf16.mxu1 %v2351_v8 }
0x11e6   :  { %2142 = vmatpush3.bf16.msra.mxu1 %v2253_v6 }
0x11e7   :  { %2155 = vmatprep.subr.bf16.mxu1 %v2351_v8 }
0x12b4   :  { %v2129_v9 = vpop.f32.mrb[28].mxu1 }
0x12b5   :  { %v1304_v10 = vpop.f32.mrb[29].mxu1 }
0x12b6   :  { %v2130_v11 = vpop.f32.mrb[30].mxu1 }
0x12b7   :  { %v1395_v12 = vpack.c.bf16 %v2130_v11, %v2129_v9  ;;  %v1307_v13 = vpop.f32.mrb[31].mxu1 }
0x12b8   :  { %v1330_v14 = vpack.c.bf16 %v1307_v13, %v1304_v10 }
0x12b9   :  { %2144 = vmatmul.mubr.msk.bf16.vlgmr.msra.gmra.mrb[32].mxu1 %vm158_vm1, %v1395_v12 }
0x12ba   :  { %2136 = vmatmul.mubr.msk.bf16.vlgmr.msra.gmra.mrb[24].mxu0 %vm158_vm1, %v1330_v14  ;;  %2171 = vmatprep.mubr.msk.bf16.mxu1 %vm2353_vm0, %v2351_v8 }
0x12bb   :  { %2151 = vmatprep.mubr.msk.bf16.mxu0 %vm2353_vm0, %v2351_v8  ;;  %2156 = vmatpush3.bf16.msra.mxu1 %v2256_v36 }
0x12bc   :  { %2157 = vmatprep.subr.bf16.mxu1 %v2351_v8 }
0x12bf   :  { %2158 = vmatpush3.bf16.msra.mxu1 %v2257_v37 }
0x12c0   :  { %2159 = vmatprep.subr.bf16.mxu1 %v2351_v8 }
0x12c3   :  { %2160 = vmatpush3.bf16.msra.mxu1 %v2258_v38 }
0x12c4   :  { %2161 = vmatprep.subr.bf16.mxu1 %v2351_v8 }
0x12c7   :  { %2162 = vmatpush3.bf16.msra.mxu1 %v2259_v41  ;;  %v1956_v41 = vld [vmem:[%s2921_s18 + $0x1] ss:$0 sm:$0xff]  ;;  %s2356_s18 = smov [#allocation2]  }
0x12c8   :  { %2163 = vmatprep.subr.bf16.mxu1 %v2351_v8 }
0x12cb   :  { %2164 = vmatpush3.bf16.msra.mxu1 %v2260_v42 }
0x12cc   :  { %2165 = vmatprep.subr.bf16.mxu1 %v2351_v8 }
0x12cf   :  { %2166 = vmatpush3.bf16.msra.mxu1 %v2261_v44 }
0x12d0   :  { %2167 = vmatprep.subr.bf16.mxu1 %v2351_v8 }
0x12d3   :  { %2168 = vmatpush3.bf16.msra.mxu1 %v2262_v4 }
0x12d4   :  { %2169 = vmatprep.subr.bf16.mxu1 %v2351_v8 }
0x12d7   :  { %2170 = vmatpush3.bf16.msra.mxu1 %v2263_v2 }
0x138c   :  { %v1445_v16 = vpop.f32.mrb[32].mxu1 }
0x138d   :  { %v1380_v17 = vpop.f32.mrb[24].mxu0  ;;  %v2145_v18 = vpop.f32.mrb[33].mxu1 }
0x138e   :  { %v1393_v19 = vadd.f32 %v1911_v15, %v1380_v17  ;;  %v2137_v20 = vpop.f32.mrb[25].mxu0  ;;  %v1448_v21 = vpop.f32.mrb[34].mxu1 }
0x138f   :  { %v1383_v22 = vpop.f32.mrb[26].mxu0  ;;  %v2146_v23 = vpop.f32.mrb[35].mxu1 }
0x1390   :  { %v1452_v24 = vadd.f32 %v1445_v16, %v1393_v19  ;;  %v1394_v25 = vadd.f32 %v1911_v15, %v1383_v22  ;;  %v2138_v58 = vpop.f32.mrb[27].mxu0  ;;  %v1945_v16 = vld [vmem:[%s2920_s17 + $0x1] ss:$0 sm:$0xff] }
0x1392   :  { %v1453_v26 = vadd.f32 %v1448_v21, %v1394_v25  ;;  %v1454_v27 = vadd.f32 %v1452_v24, %v2730_v52 }
0x1394   :  { %v1460_v28 = vsel %vm158_vm1, %v1454_v27, 0.0  ;;  %v1455_v29 = vadd.f32 %v1453_v26, %v2732_v53  ;;  %v2254_v53 = vld [vmem:[%s2917_s14 + $0x10] sm:$0xff]  }
0x1395   :  { %1461 = vadd.xlane.f32.xlu1 %v1460_v28  ;;  %2148 = vmatpush3.bf16.msra.mxu0 %v2254_v53 }
0x1396   :  { %v1463_v60 = vsel %vm158_vm1, %v1455_v29, 0.0  ;;  %2149 = vmatprep.subr.bf16.mxu0 %v2351_v8 }
0x1399   :  { %1464 = vadd.xlane.f32.xlu1 %v1463_v60  ;;  %2150 = vmatpush3.bf16.msra.mxu0 %v2255_v35 }
0x139a   :  { %2175 = vmatprep.subr.bf16.mxu0 %v2351_v8 }
0x1422   :  { %v1462_v30 = vpop.xlane.xlu1 %1461 }
0x1423   :  { %v1466_v31 = vmul.f32 0.03125, %v1462_v30 }
0x1425   :  { %v1468_v1 = vsub.f32 %v1454_v27, %v1466_v31 }
0x1426   :  { %v1465_v32 = vpop.xlane.xlu1 %1464 }
0x1427   :  { %v1467_v33 = vmul.f32 0.03125, %v1465_v32  ;;  %v1470_v39 = vmul.f32 %v1468_v1, %v1468_v1 }
0x1429   :  { %v1469_v40 = vsub.f32 %v1455_v29, %v1467_v33  ;;  %v1472_v34 = vsel %vm158_vm1, %v1470_v39, 0.0  ;;  %v2264_v39 = vld [vmem:[%s2923_s20] sm:$0xff]  }
0x142a   :  { %1473 = vadd.xlane.f32.xlu1 %v1472_v34 }
0x142b   :  { %v1471_v61 = vmul.f32 %v1469_v40, %v1469_v40 }
0x142d   :  { %v1475_v52 = vsel %vm158_vm1, %v1471_v61, 0.0 }
0x142e   :  { %1476 = vadd.xlane.f32.xlu1 %v1475_v52 }
0x14b7   :  { %v1474_v45 = vpop.xlane.xlu1 %1473 }
0x14b8   :  { %v1478_v46 = vmul.f32 0.03125, %v1474_v45 }
0x14ba   :  { %v1480_v43 = vadd.f32 1e-05, %v1478_v46 }
0x14bb   :  { %v1477_v47 = vpop.xlane.xlu1 %1476 }
0x14bc   :  { %2308 = vrsqrt.f32 %v1480_v43  ;;  %v1479_v48 = vmul.f32 0.03125, %v1477_v47 }
0x14be   :  { %v1481_v49 = vadd.f32 1e-05, %v1479_v48 }
0x14c0   :  { %2310 = vrsqrt.f32 %v1481_v49  ;;  %v1958_v49 = vld [vmem:[%s2924_s21] ss:$0 sm:$0xff] }
0x14c6   :  { %v2309_v50 = vpop.eup %2308 }
0x14c7   :  { %v1484_v51 = vmul.f32 %v2309_v50, %v1468_v1 }
0x14c9   :  { %v1492_v56 = vmul.f32 %v1917_v54, %v1484_v51 }
0x14ca   :  { %v2311_v55 = vpop.eup %2310 }
0x14cb   :  { %v1485_v57 = vmul.f32 %v2311_v55, %v1469_v40  ;;  %v1500_v63 = vadd.f32 %v1918_v59, %v1492_v56  ;;  %v2265_v40 = vld [vmem:[%s2923_s20 + $0x8] sm:$0xff]  }
0x14cd   :  { %v1493_v62 = vmul.f32 %v1917_v54, %v1485_v57 }
0x14cf   :  { %v1501_v0 = vadd.f32 %v1918_v59, %v1493_v62 }
0x14d1   :  { %v1502_v3 = vpack.c.bf16 %v1501_v0, %v1500_v63 }
0x14d3   :  { %2152 = vmatmul.mubr.msk.bf16.vlgmr.msra.gmra.mrb[28].mxu0 %vm158_vm1, %v1502_v3 }
0x14d4   :  { %2179 = vmatprep.mubr.msk.bf16.mxu0 %vm2353_vm0, %v2351_v8  ;;  %2176 = vmatpush3.bf16.msra.mxu0 %v2264_v39 }
0x14d5   :  { %2177 = vmatprep.subr.bf16.mxu0 %v2351_v8  ;;  %v1957_v8 = vld [vmem:[%s2922_s19 + $0x1] ss:$0 sm:$0xff]  ;;  %s1837_s19 = sshll.u32 %s2356_s18, 4  ;;  %s1838_s19 = int_to_ptr.vmem [resolvable:$true] %s1837_s19 }
0x14d6   :  { %s2324_s21 = scalar_lea.vmem %s1838_s19, 256  ;;  %p2329_p1 = scmp.lt.s32.totalorder %s1838_s19, %s1838_s19 }
0x14d7   :  { %p2325_p0 = scmp.ne.s32.totalorder %s1838_s19, %s2324_s21  ;;  %p2330_p2 = scmp.lt.s32.totalorder %s2324_s21, %s2324_s21 }
0x14d8   :  { %2178 = vmatpush3.bf16.msra.mxu0 %v2265_v40 }
0x14d9   :  { %p2331_p3 = por %p2330_p2, %p2329_p1 }
0x14db   :  { %p2332_p4 = pnand %p2331_p3, %p2325_p0 }
0x15a6   :  { %v1565_v6 = vpop.f32.mrb[28].mxu0 }
0x15a7   :  { %v1566_v7 = vadd.f32 %v1924_v5, %v1565_v6  ;;  %v2153_v9 = vpop.f32.mrb[29].mxu0 }
0x15a8   :  { %v1568_v10 = vpop.f32.mrb[30].mxu0 }
0x15a9   :  { %v1569_v11 = vadd.f32 %v1924_v5, %v1568_v10  ;;  %v2154_v12 = vpop.f32.mrb[31].mxu0  ;;  %v1572_v13 = vmax.f32 %v1566_v7, 0.0 }
0x15ab   :  { %v1573_v14 = vmax.f32 %v1569_v11, 0.0 }
0x15ad   :  { %v1574_v15 = vpack.c.bf16 %v1573_v14, %v1572_v13 }
0x15af   :  { %2172 = vmatmul.mubr.bf16.vlgmr.msra.gmra.mrb[36].mxu1 %v1574_v15 }
0x1682   :  { %v1682_v17 = vpop.f32.mrb[36].mxu1 }
0x1683   :  { %v1683_v18 = vadd.f32 %v1945_v16, %v1682_v17  ;;  %v2173_v19 = vpop.f32.mrb[37].mxu1 }
0x1684   :  { %v1685_v20 = vpop.f32.mrb[38].mxu1 }
0x1685   :  { %v1686_v21 = vadd.f32 %v1945_v16, %v1685_v20  ;;  %v2174_v22 = vpop.f32.mrb[39].mxu1  ;;  %v1689_v23 = vadd.f32 %v1683_v18, %v1500_v63 }
0x1687   :  { %v1695_v24 = vsel %vm158_vm1, %v1689_v23, 0.0  ;;  %v1690_v25 = vadd.f32 %v1686_v21, %v1501_v0 }
0x1688   :  { %1696 = vadd.xlane.f32.xlu0 %v1695_v24 }
0x1689   :  { %v1698_v58 = vsel %vm158_vm1, %v1690_v25, 0.0 }
0x168a   :  { %1699 = vadd.xlane.f32.xlu1 %v1698_v58 }
0x1715   :  { %v1697_v26 = vpop.xlane.xlu0 %1696 }
0x1716   :  { %v1701_v27 = vmul.f32 0.03125, %v1697_v26 }
0x1717   :  { %v1700_v28 = vpop.xlane.xlu1 %1699 }
0x1718   :  { %v1703_v29 = vsub.f32 %v1689_v23, %v1701_v27  ;;  %v1702_v60 = vmul.f32 0.03125, %v1700_v28 }
0x171a   :  { %v1704_v30 = vsub.f32 %v1690_v25, %v1702_v60  ;;  %v1705_v31 = vmul.f32 %v1703_v29, %v1703_v29 }
0x171c   :  { %v1707_v1 = vsel %vm158_vm1, %v1705_v31, 0.0  ;;  %v1706_v32 = vmul.f32 %v1704_v30, %v1704_v30 }
0x171d   :  { %1708 = vadd.xlane.f32.xlu1 %v1707_v1 }
0x171e   :  { %v1710_v33 = vsel %vm158_vm1, %v1706_v32, 0.0 }
0x1721   :  { %1711 = vadd.xlane.f32.xlu1 %v1710_v33 }
0x17aa   :  { %v1709_v34 = vpop.xlane.xlu1 %1708 }
0x17ab   :  { %v1713_v61 = vmul.f32 0.03125, %v1709_v34 }
0x17ad   :  { %v1715_v52 = vadd.f32 1e-05, %v1713_v61 }
0x17ae   :  { %v1712_v53 = vpop.xlane.xlu1 %1711 }
0x17af   :  { %2312 = vrsqrt.f32 %v1715_v52  ;;  %v1714_v35 = vmul.f32 0.03125, %v1712_v53 }
0x17b1   :  { %v1716_v36 = vadd.f32 1e-05, %v1714_v35 }
0x17b3   :  { %2314 = vrsqrt.f32 %v1716_v36 }
0x17b9   :  { %v2313_v37 = vpop.eup %2312 }
0x17ba   :  { %v1719_v38 = vmul.f32 %v2313_v37, %v1703_v29 }
0x17bc   :  { %v1727_v44 = vmul.f32 %v1956_v41, %v1719_v38 }
0x17bd   :  { %v2315_v42 = vpop.eup %2314 }
0x17be   :  { %v1720_v45 = vmul.f32 %v2315_v42, %v1704_v30  ;;  %v1735_v43 = vadd.f32 %v1957_v8, %v1727_v44 }
0x17c0   :  { %v1728_v46 = vmul.f32 %v1956_v41, %v1720_v45 }
0x17c2   :  { %v1736_v47 = vadd.f32 %v1957_v8, %v1728_v46 }
0x17c4   :  { %v1737_v48 = vpack.c.bf16 %v1736_v47, %v1735_v43 }
0x17c6   :  { %2180 = vmatmul.mubr.msk.bf16.vlgmr.msra.gmra.mrb[32].mxu0 %vm158_vm1, %v1737_v48 }
0x1899   :  { %v1798_v50 = vpop.f32.mrb[32].mxu0 }
0x189a   :  { %v1799_v51 = vadd.f32 %v1958_v49, %v1798_v50  ;;  %v2181_v54 = vpop.f32.mrb[33].mxu0 }
0x189b   :  { %v1801_v55 = vpop.f32.mrb[34].mxu0 }
0x189c   :  { %v1802_v56 = vadd.f32 %v1958_v49, %v1801_v55  ;;  %v2182_v57 = vpop.f32.mrb[35].mxu0  ;;  %v1806_v59 = vsel %vm1805_vm8, %v1799_v51, -inf }
0x189d   :  { %1807 = vmax.xlane.f32.xlu1 %v1806_v59 }
0x189e   :  { %v1809_v62 = vsel %vm1805_vm8, %v1802_v56, -inf }
0x18a1   :  { %1810 = vmax.xlane.f32.xlu1 %v1809_v62 }
0x192a   :  { %v1808_v63 = vpop.xlane.xlu1 %1807 }
0x192b   :  { %v1812_v0 = vsub.f32 %v1799_v51, %v1808_v63 }
0x192d   :  { %v1814_v3 = vmul.f32 1.442695, %v1812_v0 }
0x192e   :  { %v1811_v4 = vpop.xlane.xlu1 %1810 }
0x192f   :  { %2316 = vpow2.f32 %v1814_v3  ;;  %v1813_v2 = vsub.f32 %v1802_v56, %v1811_v4 }
0x1931   :  { %v1816_v5 = vmul.f32 1.442695, %v1813_v2 }
0x1933   :  { %2318 = vpow2.f32 %v1816_v5 }
0x1939   :  { %v2317_v6 = vpop.eup %2316 }
0x193a   :  { %v1818_v7 = vsel %vm1805_vm8, %v2317_v6, 0.0 }
0x193b   :  { %1819 = vadd.xlane.f32.xlu1 %v1818_v7 }
0x193d   :  { %v2319_v9 = vpop.eup %2318 }
0x193e   :  { %v1821_v10 = vsel %vm1805_vm8, %v2319_v9, 0.0 }
0x193f   :  { %1822 = vadd.xlane.f32.xlu1 %v1821_v10 }
0x19c8   :  { %v1820_v11 = vpop.xlane.xlu1 %1819 }
0x19c9   :  { %2320 = vlog2.f32 %v1820_v11 }
0x19cc   :  { %v1823_v12 = vpop.xlane.xlu1 %1822 }
0x19cd   :  { %2322 = vlog2.f32 %v1823_v12 }
0x19d3   :  { %v2321_v13 = vpop.eup %2320 }
0x19d4   :  { %v1825_v14 = vmul.f32 0.6931472, %v2321_v13 }
0x19d6   :  { %v1828_v15 = vsub.f32 %v1812_v0, %v1825_v14 }
0x19d7   :  { %v2323_v16 = vpop.eup %2322 }
0x19d8   :  { %1830 = vst.msk [vmem:[#allocation2] sm:$0xff] %vm1805_vm8, %v1828_v15  ;;  %v1827_v17 = vmul.f32 0.6931472, %v2323_v16 }
0x19da   :  { %v1829_v18 = vsub.f32 %v1813_v2, %v1827_v17 }
0x19dc   :  { %1831 = vst.msk [vmem:[#allocation2 + $0x8] sm:$0xff] %vm1805_vm8, %v1829_v18 }
0x19dd   :  { %2335 = shalt.err (!%p2332_p4)
}
0x19de   :  { %s2336_s7 = scalar_lea.hbm %s2925_s22, 256 }
0x19df   :  { %p2337_p5 = scmp.ne.s32.totalorder %s2925_s22, %s2336_s7  ;;  %p2340_p6 = scmp.lt.u32.totalorder %s2336_s7, %s2925_s22 }
0x19e1   :  { %p2342_p7 = pnand %p2340_p6, %p2337_p5 }
0x19e3   :  { %2345 = shalt.err (!%p2342_p7)
}
0x19e4   :  { %s2357_s26 = smov 128   ;;  %s2358_s10 = smov 8  }
0x19e5   :  { %1843 = dma.vmem_to_hbm [thread:$0]  %s1838_s19, 256, %s2925_s22, [#allocation3], %s2357_s26, %s2357_s26, %s2358_s10  }
0x19e6   :  { %2346 = dma.done.wait [#allocation3], 256  }
0x19e7   :  { %2347 = vsyncadd [#allocation3], 4294967040 }
0x19e8   :  { %1847 = vsyncpa [#allocation3], 1 }

</bundles_post_ra>
